<compile_context>
chip_gen: v7x
topology: tpu7x:2x2x1
jax: 0.10.0
libtpu: 0.0.40
codegen_flags: <defaults>
</compile_context>

<pallas_src>
import jax
import jax.numpy as jnp
from jax.experimental import pallas as pl
from jax.experimental.pallas import tpu as pltpu


_TILE_CANDIDATES = (8192, 4096, 2048, 1024, 512, 256, 128)


def _pick_tile_b(n_pad):
    """Largest lane-aligned tile; prefer >=2 grid steps (v7x megacore, pipelining)."""
    for cand in _TILE_CANDIDATES:
        if n_pad % cand == 0 and n_pad // cand >= 2:
            return cand
    for cand in _TILE_CANDIDATES:
        if n_pad % cand == 0:
            return cand
    return n_pad


def _make_kernel(transpose_in_kernel):
    def kernel(b_ref, wu_ref,              # SMEM scalar prefetch: (L,), (L,)
               x_ref, logpx_ref,           # VMEM inputs
               ut_ref, wt_ref,             # VMEM params (D, L)
               x_out_ref, logpx_out_ref):
        # Load the tile and move it to the lane-dense feature-major compute
        # layout: batch on the 128-wide lane axis, D (=32) on sublanes.
        x = x_ref[...].astype(jnp.float32)
        if transpose_in_kernel:
            x = jnp.transpose(x)                       # (tile_b, D) -> (D, tile_b)
        logpx = logpx_ref[...].astype(jnp.float32)     # (1, tile_b) lane-dense row

        # Hoisted parameter loads (review item): read once, slice as values.
        u_all = ut_ref[...].astype(jnp.float32)        # (D, L)
        w_all = wt_ref[...].astype(jnp.float32)        # (D, L)

        num_layers = ut_ref.shape[1]
        # Static unroll: L is small.  TODO(synk): for large L switch to
        # lax.fori_loop with a dynamic lane slice of the parameter block.
        for l in range(num_layers):
            u_col = u_all[:, l:l + 1]                  # (D, 1)
            w_col = w_all[:, l:l + 1]                  # (D, 1)
            b_l = b_ref[l]                             # SMEM scalar
            wu_l = wu_ref[l]                           # SMEM scalar: w_l . u_l

            # w.x on the VPU (multiply + sublane reduce), per review.
            lin = jnp.sum(x * w_col, axis=0, keepdims=True) + b_l   # (1, TB)
            t = jnp.tanh(lin)                                       # (1, TB)
            x = x + u_col * t                                       # (D, TB)

            # log-det with the hoisted per-layer scalar: psi.u = (1 - t^2)(w.u)
            det = 1.0 + (1.0 - t * t) * wu_l                         # (1, TB)
            logpx = logpx - jnp.log(jnp.abs(det) + 1e-8)

        if transpose_in_kernel:
            x = jnp.transpose(x)                       # back to (tile_b, D)
        x_out_ref[...] = x.astype(x_out_ref.dtype)
        logpx_out_ref[...] = logpx.astype(logpx_out_ref.dtype)

    return kernel


def _run(b32, wu, x_arr, lp_row, uT, wT, *, tile_b, transpose_in_kernel, out_dtype):
    D, L = uT.shape
    if transpose_in_kernel:
        n_pad = x_arr.shape[0]                         # x_arr: (n_pad, D) batch-major
        x_block = (tile_b, D)
        x_map = lambda i, b_s, wu_s: (i, 0)
        x_oshape = (n_pad, D)
    else:
        n_pad = x_arr.shape[1]                         # x_arr: (D, n_pad) feature-major
        x_block = (D, tile_b)
        x_map = lambda i, b_s, wu_s: (0, i)
        x_oshape = (D, n_pad)

    grid = (n_pad // tile_b,)
    lp_spec = pl.BlockSpec((1, tile_b), lambda i, b_s, wu_s: (0, i))
    param_spec = pl.BlockSpec((D, L), lambda i, b_s, wu_s: (0, 0))

    # (tile_b, 32) blocks lane-pad to 128 in VMEM: budget ~4 double-buffered
    # blocks plus headroom.  Safe on v5e/v6e/v7x for tile_b <= 8192.
    vmem_limit = 4 * tile_b * 128 * 4 + 24 * 1024 * 1024

    return pl.pallas_call(
        _make_kernel(transpose_in_kernel),
        out_shape=(
            jax.ShapeDtypeStruct(x_oshape, out_dtype),
            jax.ShapeDtypeStruct((1, n_pad), jnp.float32),
        ),
        grid_spec=pltpu.PrefetchScalarGridSpec(
            num_scalar_prefetch=2,                     # b, w.u -> SMEM
            grid=grid,
            in_specs=[
                pl.BlockSpec(x_block, x_map),          # x
                lp_spec,                               # log_px row
                param_spec,                            # u^T (D, L)
                param_spec,                            # w^T (D, L)
            ],
            out_specs=[
                pl.BlockSpec(x_block, x_map),
                lp_spec,
            ],
        ),
        compiler_params=pltpu.CompilerParams(
            dimension_semantics=("parallel",),
            vmem_limit_bytes=vmem_limit),
    )(b32, wu, x_arr, lp_row, uT, wT)


def normalizing_flow_forward(x, log_px, u, w, b, *, tile_b=None):
    """x: (N, D), log_px: (N,), u/w: (L, D), b: (L,).  Returns (x_out, log_px_out)."""
    N, D = x.shape
    out_dtype = x.dtype                                # bf16 in -> bf16 out (HBM I/O)

    u32 = u.astype(jnp.float32)
    w32 = w.astype(jnp.float32)
    b32 = b.astype(jnp.float32)
    wu = jnp.sum(w32 * u32, axis=-1)                   # (L,) per-layer w_l . u_l
    uT = u32.T                                         # (D, L) tiny param transposes
    wT = w32.T

    # Pad the batch to a 128 multiple (lane alignment) instead of degenerating
    # to a single-step grid; padded rows are discarded below.
    n_pad = 128 * pl.cdiv(N, 128)
    x_p = x if n_pad == N else jnp.pad(x, ((0, n_pad - N), (0, 0)))
    lp_flat = log_px.reshape(-1).astype(jnp.float32)
    lp_p = lp_flat if n_pad == N else jnp.pad(lp_flat, (0, n_pad - N))
    lp_row = lp_p.reshape(1, n_pad)                    # free reshape, lane-dense row

    if tile_b is None:
        tile_b = _pick_tile_b(n_pad)
    assert n_pad % tile_b == 0 and tile_b % 128 == 0

    try:
        # Fast path: batch-major HBM I/O, layout conversion done in-kernel.
        x_out, lp_out = _run(b32, wu, x_p, lp_row, uT, wT, tile_b=tile_b,
                             transpose_in_kernel=True, out_dtype=out_dtype)
    except Exception:
        # TODO(synk): portability guard -- if this Mosaic build cannot lower the
        # in-kernel (tile_b, D) <-> (D, tile_b) transpose, fall back to the old
        # feature-major HBM layout (one extra HBM round-trip of x per side).
        xT_out, lp_out = _run(b32, wu, x_p.T, lp_row, uT, wT, tile_b=tile_b,
                              transpose_in_kernel=False, out_dtype=out_dtype)
        x_out = xT_out.T

    if n_pad != N:
        x_out = x_out[:N]
        lp_out = lp_out[:, :N]
    return x_out, lp_out.reshape(log_px.shape).astype(log_px.dtype)


def _reference_forward(x, log_px, u, w, b):
    """Plain-JAX reference of the same planar-flow stack."""
    x = x.astype(jnp.float32)
    log_px = log_px.astype(jnp.float32)
    for l in range(u.shape[0]):
        lin = jnp.sum(x * w[l][None, :], axis=-1, keepdims=True) + b[l]
        t = jnp.tanh(lin)
        x = x + u[l][None, :] * t
        psi = (1.0 - t * t) * w[l][None, :]
        det = 1.0 + jnp.sum(psi * u[l][None, :], axis=-1, keepdims=True)
        log_px = log_px - jnp.log(jnp.abs(det) + 1e-8).reshape(-1)
    return x, log_px


if __name__ == "__main__":
    # NormalizingFlow(dim=32, flow=PlanarFlow, num_layers=4); batch=512 gives a
    # multi-step grid (2 x 256-row tiles) so pipelining / both v7x cores engage.
    N, D, L = 512, 32, 4
    key = jax.random.PRNGKey(0)
    kx, klp, ku, kw, kb = jax.random.split(key, 5)

    x = jax.random.normal(kx, (N, D), dtype=jnp.float32)
    log_px = jax.random.normal(klp, (N,), dtype=jnp.float32)
    u = 0.1 * jax.random.normal(ku, (L, D), dtype=jnp.float32)
    w = 0.1 * jax.random.normal(kw, (L, D), dtype=jnp.float32)
    b = 0.1 * jax.random.normal(kb, (L,), dtype=jnp.float32)

    x_out, lp_out = normalizing_flow_forward(x, log_px, u, w, b)
    jax.block_until_ready((x_out, lp_out))
    x_ref, lp_ref = _reference_forward(x, log_px, u, w, b)
    assert jnp.allclose(x_out, x_ref, atol=1e-5, rtol=1e-5)
    assert jnp.allclose(lp_out, lp_ref, atol=1e-5, rtol=1e-5)

    # Ragged batch exercises the pad-to-128 path (no degenerate grid=1 fallback).
    N2 = 200
    x2, lp2 = x[:N2], log_px[:N2]
    x2_out, lp2_out = normalizing_flow_forward(x2, lp2, u, w, b)
    jax.block_until_ready((x2_out, lp2_out))
    x2_ref, lp2_ref = _reference_forward(x2, lp2, u, w, b)
    assert jnp.allclose(x2_out, x2_ref, atol=1e-5, rtol=1e-5)
    assert jnp.allclose(lp2_out, lp2_ref, atol=1e-5, rtol=1e-5)

    print("KERNEL_OK")
</pallas_src>

<mosaic_0001>
module attributes {stable_mosaic.version = 11 : i64} {
  func.func @kernel(%arg0: i32, %arg1: memref<4xf32, #tpu.memory_space<smem>>, %arg2: memref<4xf32, #tpu.memory_space<smem>>, %arg3: memref<256x32xf32, #tpu.memory_space<vmem>>, %arg4: memref<1x256xf32, #tpu.memory_space<vmem>>, %arg5: memref<32x4xf32, #tpu.memory_space<vmem>>, %arg6: memref<32x4xf32, #tpu.memory_space<vmem>>, %arg7: memref<256x32xf32, #tpu.memory_space<vmem>>, %arg8: memref<1x256xf32, #tpu.memory_space<vmem>>) attributes {dimension_semantics = [#tpu.dimension_semantics<parallel>], iteration_bounds = array<i64: 2>, scalar_prefetch = 2 : i64, scratch_operands = 0 : i64, tpu.core_type = #tpu.core_type<tc>, window_params = [{transform_indices = @transform_0, window_bounds = array<i64: 256, 32>}, {transform_indices = @transform_1, window_bounds = array<i64: 1, 256>}, {pipeline_mode = #tpu.pipeline_mode<synchronous>, transform_indices = @transform_2, window_bounds = array<i64: 32, 4>}, {pipeline_mode = #tpu.pipeline_mode<synchronous>, transform_indices = @transform_3, window_bounds = array<i64: 32, 4>}, {transform_indices = @transform_4, window_bounds = array<i64: 256, 32>}, {transform_indices = @transform_5, window_bounds = array<i64: 1, 256>}]} {
    %c0 = arith.constant 0 : index
    %c0_0 = arith.constant 0 : index
    %0 = vector.load %arg3[%c0, %c0_0] : memref<256x32xf32, #tpu.memory_space<vmem>>, vector<256x32xf32>
    %1 = tpu.transpose %0, [1, 0] : vector<256x32xf32> -> vector<32x256xf32>
    %c0_1 = arith.constant 0 : index
    %c0_2 = arith.constant 0 : index
    %2 = vector.load %arg4[%c0_1, %c0_2] : memref<1x256xf32, #tpu.memory_space<vmem>>, vector<1x256xf32>
    %c0_3 = arith.constant 0 : index
    %c0_4 = arith.constant 0 : index
    %3 = vector.load %arg5[%c0_3, %c0_4] : memref<32x4xf32, #tpu.memory_space<vmem>>, vector<32x4xf32>
    %c0_5 = arith.constant 0 : index
    %c0_6 = arith.constant 0 : index
    %4 = vector.load %arg6[%c0_5, %c0_6] : memref<32x4xf32, #tpu.memory_space<vmem>>, vector<32x4xf32>
    %5 = vector.extract_strided_slice %3 {offsets = [0, 0], sizes = [32, 1], strides = [1, 1]} : vector<32x4xf32> to vector<32x1xf32>
    %6 = vector.extract_strided_slice %4 {offsets = [0, 0], sizes = [32, 1], strides = [1, 1]} : vector<32x4xf32> to vector<32x1xf32>
    %c0_7 = arith.constant 0 : index
    %7 = memref.load %arg1[%c0_7] : memref<4xf32, #tpu.memory_space<smem>>
    %c0_8 = arith.constant 0 : index
    %8 = memref.load %arg2[%c0_8] : memref<4xf32, #tpu.memory_space<smem>>
    %9 = vector.broadcast %6 : vector<32x1xf32> to vector<32x256xf32>
    %10 = arith.mulf %1, %9 : vector<32x256xf32>
    %cst = arith.constant dense<0.000000e+00> : vector<256xf32>
    %11 = vector.multi_reduction <add>, %10, %cst [0] : vector<32x256xf32> to vector<256xf32>
    %12 = vector.shape_cast %11 : vector<256xf32> to vector<1x256xf32>
    %13 = vector.broadcast %7 : f32 to vector<1x256xf32>
    %14 = arith.addf %12, %13 : vector<1x256xf32>
    %15 = math.tanh %14 : vector<1x256xf32>
    %16 = vector.broadcast %5 : vector<32x1xf32> to vector<32x256xf32>
    %17 = vector.broadcast %15 : vector<1x256xf32> to vector<32x256xf32>
    %18 = arith.mulf %16, %17 : vector<32x256xf32>
    %19 = arith.addf %1, %18 : vector<32x256xf32>
    %20 = arith.mulf %15, %15 : vector<1x256xf32>
    %cst_9 = arith.constant 1.000000e+00 : f32
    %21 = vector.broadcast %cst_9 : f32 to vector<1x256xf32>
    %22 = arith.subf %21, %20 : vector<1x256xf32>
    %23 = vector.broadcast %8 : f32 to vector<1x256xf32>
    %24 = arith.mulf %22, %23 : vector<1x256xf32>
    %cst_10 = arith.constant 1.000000e+00 : f32
    %25 = vector.broadcast %cst_10 : f32 to vector<1x256xf32>
    %26 = arith.addf %25, %24 : vector<1x256xf32>
    %27 = math.absf %26 : vector<1x256xf32>
    %cst_11 = arith.constant 9.99999993E-9 : f32
    %28 = vector.broadcast %cst_11 : f32 to vector<1x256xf32>
    %29 = arith.addf %27, %28 : vector<1x256xf32>
    %30 = math.log %29 : vector<1x256xf32>
    %31 = arith.subf %2, %30 : vector<1x256xf32>
    %32 = vector.extract_strided_slice %3 {offsets = [0, 1], sizes = [32, 1], strides = [1, 1]} : vector<32x4xf32> to vector<32x1xf32>
    %33 = vector.extract_strided_slice %4 {offsets = [0, 1], sizes = [32, 1], strides = [1, 1]} : vector<32x4xf32> to vector<32x1xf32>
    %c1 = arith.constant 1 : index
    %34 = memref.load %arg1[%c1] : memref<4xf32, #tpu.memory_space<smem>>
    %c1_12 = arith.constant 1 : index
    %35 = memref.load %arg2[%c1_12] : memref<4xf32, #tpu.memory_space<smem>>
    %36 = vector.broadcast %33 : vector<32x1xf32> to vector<32x256xf32>
    %37 = arith.mulf %19, %36 : vector<32x256xf32>
    %cst_13 = arith.constant dense<0.000000e+00> : vector<256xf32>
    %38 = vector.multi_reduction <add>, %37, %cst_13 [0] : vector<32x256xf32> to vector<256xf32>
    %39 = vector.shape_cast %38 : vector<256xf32> to vector<1x256xf32>
    %40 = vector.broadcast %34 : f32 to vector<1x256xf32>
    %41 = arith.addf %39, %40 : vector<1x256xf32>
    %42 = math.tanh %41 : vector<1x256xf32>
    %43 = vector.broadcast %32 : vector<32x1xf32> to vector<32x256xf32>
    %44 = vector.broadcast %42 : vector<1x256xf32> to vector<32x256xf32>
    %45 = arith.mulf %43, %44 : vector<32x256xf32>
    %46 = arith.addf %19, %45 : vector<32x256xf32>
    %47 = arith.mulf %42, %42 : vector<1x256xf32>
    %cst_14 = arith.constant 1.000000e+00 : f32
    %48 = vector.broadcast %cst_14 : f32 to vector<1x256xf32>
    %49 = arith.subf %48, %47 : vector<1x256xf32>
    %50 = vector.broadcast %35 : f32 to vector<1x256xf32>
    %51 = arith.mulf %49, %50 : vector<1x256xf32>
    %cst_15 = arith.constant 1.000000e+00 : f32
    %52 = vector.broadcast %cst_15 : f32 to vector<1x256xf32>
    %53 = arith.addf %52, %51 : vector<1x256xf32>
    %54 = math.absf %53 : vector<1x256xf32>
    %cst_16 = arith.constant 9.99999993E-9 : f32
    %55 = vector.broadcast %cst_16 : f32 to vector<1x256xf32>
    %56 = arith.addf %54, %55 : vector<1x256xf32>
    %57 = math.log %56 : vector<1x256xf32>
    %58 = arith.subf %31, %57 : vector<1x256xf32>
    %59 = vector.extract_strided_slice %3 {offsets = [0, 2], sizes = [32, 1], strides = [1, 1]} : vector<32x4xf32> to vector<32x1xf32>
    %60 = vector.extract_strided_slice %4 {offsets = [0, 2], sizes = [32, 1], strides = [1, 1]} : vector<32x4xf32> to vector<32x1xf32>
    %c2 = arith.constant 2 : index
    %61 = memref.load %arg1[%c2] : memref<4xf32, #tpu.memory_space<smem>>
    %c2_17 = arith.constant 2 : index
    %62 = memref.load %arg2[%c2_17] : memref<4xf32, #tpu.memory_space<smem>>
    %63 = vector.broadcast %60 : vector<32x1xf32> to vector<32x256xf32>
    %64 = arith.mulf %46, %63 : vector<32x256xf32>
    %cst_18 = arith.constant dense<0.000000e+00> : vector<256xf32>
    %65 = vector.multi_reduction <add>, %64, %cst_18 [0] : vector<32x256xf32> to vector<256xf32>
    %66 = vector.shape_cast %65 : vector<256xf32> to vector<1x256xf32>
    %67 = vector.broadcast %61 : f32 to vector<1x256xf32>
    %68 = arith.addf %66, %67 : vector<1x256xf32>
    %69 = math.tanh %68 : vector<1x256xf32>
    %70 = vector.broadcast %59 : vector<32x1xf32> to vector<32x256xf32>
    %71 = vector.broadcast %69 : vector<1x256xf32> to vector<32x256xf32>
    %72 = arith.mulf %70, %71 : vector<32x256xf32>
    %73 = arith.addf %46, %72 : vector<32x256xf32>
    %74 = arith.mulf %69, %69 : vector<1x256xf32>
    %cst_19 = arith.constant 1.000000e+00 : f32
    %75 = vector.broadcast %cst_19 : f32 to vector<1x256xf32>
    %76 = arith.subf %75, %74 : vector<1x256xf32>
    %77 = vector.broadcast %62 : f32 to vector<1x256xf32>
    %78 = arith.mulf %76, %77 : vector<1x256xf32>
    %cst_20 = arith.constant 1.000000e+00 : f32
    %79 = vector.broadcast %cst_20 : f32 to vector<1x256xf32>
    %80 = arith.addf %79, %78 : vector<1x256xf32>
    %81 = math.absf %80 : vector<1x256xf32>
    %cst_21 = arith.constant 9.99999993E-9 : f32
    %82 = vector.broadcast %cst_21 : f32 to vector<1x256xf32>
    %83 = arith.addf %81, %82 : vector<1x256xf32>
    %84 = math.log %83 : vector<1x256xf32>
    %85 = arith.subf %58, %84 : vector<1x256xf32>
    %86 = vector.extract_strided_slice %3 {offsets = [0, 3], sizes = [32, 1], strides = [1, 1]} : vector<32x4xf32> to vector<32x1xf32>
    %87 = vector.extract_strided_slice %4 {offsets = [0, 3], sizes = [32, 1], strides = [1, 1]} : vector<32x4xf32> to vector<32x1xf32>
    %c3 = arith.constant 3 : index
    %88 = memref.load %arg1[%c3] : memref<4xf32, #tpu.memory_space<smem>>
    %c3_22 = arith.constant 3 : index
    %89 = memref.load %arg2[%c3_22] : memref<4xf32, #tpu.memory_space<smem>>
    %90 = vector.broadcast %87 : vector<32x1xf32> to vector<32x256xf32>
    %91 = arith.mulf %73, %90 : vector<32x256xf32>
    %cst_23 = arith.constant dense<0.000000e+00> : vector<256xf32>
    %92 = vector.multi_reduction <add>, %91, %cst_23 [0] : vector<32x256xf32> to vector<256xf32>
    %93 = vector.shape_cast %92 : vector<256xf32> to vector<1x256xf32>
    %94 = vector.broadcast %88 : f32 to vector<1x256xf32>
    %95 = arith.addf %93, %94 : vector<1x256xf32>
    %96 = math.tanh %95 : vector<1x256xf32>
    %97 = vector.broadcast %86 : vector<32x1xf32> to vector<32x256xf32>
    %98 = vector.broadcast %96 : vector<1x256xf32> to vector<32x256xf32>
    %99 = arith.mulf %97, %98 : vector<32x256xf32>
    %100 = arith.addf %73, %99 : vector<32x256xf32>
    %101 = arith.mulf %96, %96 : vector<1x256xf32>
    %cst_24 = arith.constant 1.000000e+00 : f32
    %102 = vector.broadcast %cst_24 : f32 to vector<1x256xf32>
    %103 = arith.subf %102, %101 : vector<1x256xf32>
    %104 = vector.broadcast %89 : f32 to vector<1x256xf32>
    %105 = arith.mulf %103, %104 : vector<1x256xf32>
    %cst_25 = arith.constant 1.000000e+00 : f32
    %106 = vector.broadcast %cst_25 : f32 to vector<1x256xf32>
    %107 = arith.addf %106, %105 : vector<1x256xf32>
    %108 = math.absf %107 : vector<1x256xf32>
    %cst_26 = arith.constant 9.99999993E-9 : f32
    %109 = vector.broadcast %cst_26 : f32 to vector<1x256xf32>
    %110 = arith.addf %108, %109 : vector<1x256xf32>
    %111 = math.log %110 : vector<1x256xf32>
    %112 = arith.subf %85, %111 : vector<1x256xf32>
    %113 = tpu.transpose %100, [1, 0] : vector<32x256xf32> -> vector<256x32xf32>
    %c0_27 = arith.constant 0 : index
    %c0_28 = arith.constant 0 : index
    %114 = vector.load %arg7[%c0_27, %c0_28] : memref<256x32xf32, #tpu.memory_space<vmem>>, vector<256x32xf32>
    tpu.vector_store %arg7[%c0_27, %c0_28], %113 {strides = array<i32>} : memref<256x32xf32, #tpu.memory_space<vmem>>, vector<256x32xf32>,
    %c0_29 = arith.constant 0 : index
    %c0_30 = arith.constant 0 : index
    %115 = vector.load %arg8[%c0_29, %c0_30] : memref<1x256xf32, #tpu.memory_space<vmem>>, vector<1x256xf32>
    tpu.vector_store %arg8[%c0_29, %c0_30], %112 {strides = array<i32>} : memref<1x256xf32, #tpu.memory_space<vmem>>, vector<1x256xf32>,
    return
  }
  func.func @transform_0(%arg0: i32, %arg1: memref<4xf32, #tpu.memory_space<smem>>, %arg2: memref<4xf32, #tpu.memory_space<smem>>) -> (i32, i32) {
    %c0_i32 = arith.constant 0 : i32
    %c0_i32_0 = arith.constant 0 : i32
    return %arg0, %c0_i32 : i32, i32
  }
  func.func @transform_1(%arg0: i32, %arg1: memref<4xf32, #tpu.memory_space<smem>>, %arg2: memref<4xf32, #tpu.memory_space<smem>>) -> (i32, i32) {
    %c0_i32 = arith.constant 0 : i32
    %c0_i32_0 = arith.constant 0 : i32
    return %c0_i32, %arg0 : i32, i32
  }
  func.func @transform_2(%arg0: i32, %arg1: memref<4xf32, #tpu.memory_space<smem>>, %arg2: memref<4xf32, #tpu.memory_space<smem>>) -> (i32, i32) {
    %c0_i32 = arith.constant 0 : i32
    %c0_i32_0 = arith.constant 0 : i32
    %c0_i32_1 = arith.constant 0 : i32
    return %c0_i32, %c0_i32_0 : i32, i32
  }
  func.func @transform_3(%arg0: i32, %arg1: memref<4xf32, #tpu.memory_space<smem>>, %arg2: memref<4xf32, #tpu.memory_space<smem>>) -> (i32, i32) {
    %c0_i32 = arith.constant 0 : i32
    %c0_i32_0 = arith.constant 0 : i32
    %c0_i32_1 = arith.constant 0 : i32
    return %c0_i32, %c0_i32_0 : i32, i32
  }
  func.func @transform_4(%arg0: i32, %arg1: memref<4xf32, #tpu.memory_space<smem>>, %arg2: memref<4xf32, #tpu.memory_space<smem>>) -> (i32, i32) {
    %c0_i32 = arith.constant 0 : i32
    %c0_i32_0 = arith.constant 0 : i32
    return %arg0, %c0_i32 : i32, i32
  }
  func.func @transform_5(%arg0: i32, %arg1: memref<4xf32, #tpu.memory_space<smem>>, %arg2: memref<4xf32, #tpu.memory_space<smem>>) -> (i32, i32) {
    %c0_i32 = arith.constant 0 : i32
    %c0_i32_0 = arith.constant 0 : i32
    return %c0_i32, %arg0 : i32, i32
  }
}

module attributes {stable_mosaic.version = 11 : i64} {
  func.func @kernel(%arg0: i32, %arg1: memref<4xf32, #tpu.memory_space<smem>>, %arg2: memref<4xf32, #tpu.memory_space<smem>>, %arg3: memref<32x256xf32, #tpu.memory_space<vmem>>, %arg4: memref<1x256xf32, #tpu.memory_space<vmem>>, %arg5: memref<32x4xf32, #tpu.memory_space<vmem>>, %arg6: memref<32x4xf32, #tpu.memory_space<vmem>>, %arg7: memref<32x256xf32, #tpu.memory_space<vmem>>, %arg8: memref<1x256xf32, #tpu.memory_space<vmem>>) attributes {dimension_semantics = [#tpu.dimension_semantics<parallel>], iteration_bounds = array<i64: 2>, scalar_prefetch = 2 : i64, scratch_operands = 0 : i64, tpu.core_type = #tpu.core_type<tc>, window_params = [{transform_indices = @transform_0, window_bounds = array<i64: 32, 256>}, {transform_indices = @transform_1, window_bounds = array<i64: 1, 256>}, {pipeline_mode = #tpu.pipeline_mode<synchronous>, transform_indices = @transform_2, window_bounds = array<i64: 32, 4>}, {pipeline_mode = #tpu.pipeline_mode<synchronous>, transform_indices = @transform_3, window_bounds = array<i64: 32, 4>}, {transform_indices = @transform_4, window_bounds = array<i64: 32, 256>}, {transform_indices = @transform_5, window_bounds = array<i64: 1, 256>}]} {
    %c0 = arith.constant 0 : index
    %c0_0 = arith.constant 0 : index
    %0 = vector.load %arg3[%c0, %c0_0] : memref<32x256xf32, #tpu.memory_space<vmem>>, vector<32x256xf32>
    %c0_1 = arith.constant 0 : index
    %c0_2 = arith.constant 0 : index
    %1 = vector.load %arg4[%c0_1, %c0_2] : memref<1x256xf32, #tpu.memory_space<vmem>>, vector<1x256xf32>
    %c0_3 = arith.constant 0 : index
    %c0_4 = arith.constant 0 : index
    %2 = vector.load %arg5[%c0_3, %c0_4] : memref<32x4xf32, #tpu.memory_space<vmem>>, vector<32x4xf32>
    %c0_5 = arith.constant 0 : index
    %c0_6 = arith.constant 0 : index
    %3 = vector.load %arg6[%c0_5, %c0_6] : memref<32x4xf32, #tpu.memory_space<vmem>>, vector<32x4xf32>
    %4 = vector.extract_strided_slice %2 {offsets = [0, 0], sizes = [32, 1], strides = [1, 1]} : vector<32x4xf32> to vector<32x1xf32>
    %5 = vector.extract_strided_slice %3 {offsets = [0, 0], sizes = [32, 1], strides = [1, 1]} : vector<32x4xf32> to vector<32x1xf32>
    %c0_7 = arith.constant 0 : index
    %6 = memref.load %arg1[%c0_7] : memref<4xf32, #tpu.memory_space<smem>>
    %c0_8 = arith.constant 0 : index
    %7 = memref.load %arg2[%c0_8] : memref<4xf32, #tpu.memory_space<smem>>
    %8 = vector.broadcast %5 : vector<32x1xf32> to vector<32x256xf32>
    %9 = arith.mulf %0, %8 : vector<32x256xf32>
    %cst = arith.constant dense<0.000000e+00> : vector<256xf32>
    %10 = vector.multi_reduction <add>, %9, %cst [0] : vector<32x256xf32> to vector<256xf32>
    %11 = vector.shape_cast %10 : vector<256xf32> to vector<1x256xf32>
    %12 = vector.broadcast %6 : f32 to vector<1x256xf32>
    %13 = arith.addf %11, %12 : vector<1x256xf32>
    %14 = math.tanh %13 : vector<1x256xf32>
    %15 = vector.broadcast %4 : vector<32x1xf32> to vector<32x256xf32>
    %16 = vector.broadcast %14 : vector<1x256xf32> to vector<32x256xf32>
    %17 = arith.mulf %15, %16 : vector<32x256xf32>
    %18 = arith.addf %0, %17 : vector<32x256xf32>
    %19 = arith.mulf %14, %14 : vector<1x256xf32>
    %cst_9 = arith.constant 1.000000e+00 : f32
    %20 = vector.broadcast %cst_9 : f32 to vector<1x256xf32>
    %21 = arith.subf %20, %19 : vector<1x256xf32>
    %22 = vector.broadcast %7 : f32 to vector<1x256xf32>
    %23 = arith.mulf %21, %22 : vector<1x256xf32>
    %cst_10 = arith.constant 1.000000e+00 : f32
    %24 = vector.broadcast %cst_10 : f32 to vector<1x256xf32>
    %25 = arith.addf %24, %23 : vector<1x256xf32>
    %26 = math.absf %25 : vector<1x256xf32>
    %cst_11 = arith.constant 9.99999993E-9 : f32
    %27 = vector.broadcast %cst_11 : f32 to vector<1x256xf32>
    %28 = arith.addf %26, %27 : vector<1x256xf32>
    %29 = math.log %28 : vector<1x256xf32>
    %30 = arith.subf %1, %29 : vector<1x256xf32>
    %31 = vector.extract_strided_slice %2 {offsets = [0, 1], sizes = [32, 1], strides = [1, 1]} : vector<32x4xf32> to vector<32x1xf32>
    %32 = vector.extract_strided_slice %3 {offsets = [0, 1], sizes = [32, 1], strides = [1, 1]} : vector<32x4xf32> to vector<32x1xf32>
    %c1 = arith.constant 1 : index
    %33 = memref.load %arg1[%c1] : memref<4xf32, #tpu.memory_space<smem>>
    %c1_12 = arith.constant 1 : index
    %34 = memref.load %arg2[%c1_12] : memref<4xf32, #tpu.memory_space<smem>>
    %35 = vector.broadcast %32 : vector<32x1xf32> to vector<32x256xf32>
    %36 = arith.mulf %18, %35 : vector<32x256xf32>
    %cst_13 = arith.constant dense<0.000000e+00> : vector<256xf32>
    %37 = vector.multi_reduction <add>, %36, %cst_13 [0] : vector<32x256xf32> to vector<256xf32>
    %38 = vector.shape_cast %37 : vector<256xf32> to vector<1x256xf32>
    %39 = vector.broadcast %33 : f32 to vector<1x256xf32>
    %40 = arith.addf %38, %39 : vector<1x256xf32>
    %41 = math.tanh %40 : vector<1x256xf32>
    %42 = vector.broadcast %31 : vector<32x1xf32> to vector<32x256xf32>
    %43 = vector.broadcast %41 : vector<1x256xf32> to vector<32x256xf32>
    %44 = arith.mulf %42, %43 : vector<32x256xf32>
    %45 = arith.addf %18, %44 : vector<32x256xf32>
    %46 = arith.mulf %41, %41 : vector<1x256xf32>
    %cst_14 = arith.constant 1.000000e+00 : f32
    %47 = vector.broadcast %cst_14 : f32 to vector<1x256xf32>
    %48 = arith.subf %47, %46 : vector<1x256xf32>
    %49 = vector.broadcast %34 : f32 to vector<1x256xf32>
    %50 = arith.mulf %48, %49 : vector<1x256xf32>
    %cst_15 = arith.constant 1.000000e+00 : f32
    %51 = vector.broadcast %cst_15 : f32 to vector<1x256xf32>
    %52 = arith.addf %51, %50 : vector<1x256xf32>
    %53 = math.absf %52 : vector<1x256xf32>
    %cst_16 = arith.constant 9.99999993E-9 : f32
    %54 = vector.broadcast %cst_16 : f32 to vector<1x256xf32>
    %55 = arith.addf %53, %54 : vector<1x256xf32>
    %56 = math.log %55 : vector<1x256xf32>
    %57 = arith.subf %30, %56 : vector<1x256xf32>
    %58 = vector.extract_strided_slice %2 {offsets = [0, 2], sizes = [32, 1], strides = [1, 1]} : vector<32x4xf32> to vector<32x1xf32>
    %59 = vector.extract_strided_slice %3 {offsets = [0, 2], sizes = [32, 1], strides = [1, 1]} : vector<32x4xf32> to vector<32x1xf32>
    %c2 = arith.constant 2 : index
    %60 = memref.load %arg1[%c2] : memref<4xf32, #tpu.memory_space<smem>>
    %c2_17 = arith.constant 2 : index
    %61 = memref.load %arg2[%c2_17] : memref<4xf32, #tpu.memory_space<smem>>
    %62 = vector.broadcast %59 : vector<32x1xf32> to vector<32x256xf32>
    %63 = arith.mulf %45, %62 : vector<32x256xf32>
    %cst_18 = arith.constant dense<0.000000e+00> : vector<256xf32>
    %64 = vector.multi_reduction <add>, %63, %cst_18 [0] : vector<32x256xf32> to vector<256xf32>
    %65 = vector.shape_cast %64 : vector<256xf32> to vector<1x256xf32>
    %66 = vector.broadcast %60 : f32 to vector<1x256xf32>
    %67 = arith.addf %65, %66 : vector<1x256xf32>
    %68 = math.tanh %67 : vector<1x256xf32>
    %69 = vector.broadcast %58 : vector<32x1xf32> to vector<32x256xf32>
    %70 = vector.broadcast %68 : vector<1x256xf32> to vector<32x256xf32>
    %71 = arith.mulf %69, %70 : vector<32x256xf32>
    %72 = arith.addf %45, %71 : vector<32x256xf32>
    %73 = arith.mulf %68, %68 : vector<1x256xf32>
    %cst_19 = arith.constant 1.000000e+00 : f32
    %74 = vector.broadcast %cst_19 : f32 to vector<1x256xf32>
    %75 = arith.subf %74, %73 : vector<1x256xf32>
    %76 = vector.broadcast %61 : f32 to vector<1x256xf32>
    %77 = arith.mulf %75, %76 : vector<1x256xf32>
    %cst_20 = arith.constant 1.000000e+00 : f32
    %78 = vector.broadcast %cst_20 : f32 to vector<1x256xf32>
    %79 = arith.addf %78, %77 : vector<1x256xf32>
    %80 = math.absf %79 : vector<1x256xf32>
    %cst_21 = arith.constant 9.99999993E-9 : f32
    %81 = vector.broadcast %cst_21 : f32 to vector<1x256xf32>
    %82 = arith.addf %80, %81 : vector<1x256xf32>
    %83 = math.log %82 : vector<1x256xf32>
    %84 = arith.subf %57, %83 : vector<1x256xf32>
    %85 = vector.extract_strided_slice %2 {offsets = [0, 3], sizes = [32, 1], strides = [1, 1]} : vector<32x4xf32> to vector<32x1xf32>
    %86 = vector.extract_strided_slice %3 {offsets = [0, 3], sizes = [32, 1], strides = [1, 1]} : vector<32x4xf32> to vector<32x1xf32>
    %c3 = arith.constant 3 : index
    %87 = memref.load %arg1[%c3] : memref<4xf32, #tpu.memory_space<smem>>
    %c3_22 = arith.constant 3 : index
    %88 = memref.load %arg2[%c3_22] : memref<4xf32, #tpu.memory_space<smem>>
    %89 = vector.broadcast %86 : vector<32x1xf32> to vector<32x256xf32>
    %90 = arith.mulf %72, %89 : vector<32x256xf32>
    %cst_23 = arith.constant dense<0.000000e+00> : vector<256xf32>
    %91 = vector.multi_reduction <add>, %90, %cst_23 [0] : vector<32x256xf32> to vector<256xf32>
    %92 = vector.shape_cast %91 : vector<256xf32> to vector<1x256xf32>
    %93 = vector.broadcast %87 : f32 to vector<1x256xf32>
    %94 = arith.addf %92, %93 : vector<1x256xf32>
    %95 = math.tanh %94 : vector<1x256xf32>
    %96 = vector.broadcast %85 : vector<32x1xf32> to vector<32x256xf32>
    %97 = vector.broadcast %95 : vector<1x256xf32> to vector<32x256xf32>
    %98 = arith.mulf %96, %97 : vector<32x256xf32>
    %99 = arith.addf %72, %98 : vector<32x256xf32>
    %100 = arith.mulf %95, %95 : vector<1x256xf32>
    %cst_24 = arith.constant 1.000000e+00 : f32
    %101 = vector.broadcast %cst_24 : f32 to vector<1x256xf32>
    %102 = arith.subf %101, %100 : vector<1x256xf32>
    %103 = vector.broadcast %88 : f32 to vector<1x256xf32>
    %104 = arith.mulf %102, %103 : vector<1x256xf32>
    %cst_25 = arith.constant 1.000000e+00 : f32
    %105 = vector.broadcast %cst_25 : f32 to vector<1x256xf32>
    %106 = arith.addf %105, %104 : vector<1x256xf32>
    %107 = math.absf %106 : vector<1x256xf32>
    %cst_26 = arith.constant 9.99999993E-9 : f32
    %108 = vector.broadcast %cst_26 : f32 to vector<1x256xf32>
    %109 = arith.addf %107, %108 : vector<1x256xf32>
    %110 = math.log %109 : vector<1x256xf32>
    %111 = arith.subf %84, %110 : vector<1x256xf32>
    %c0_27 = arith.constant 0 : index
    %c0_28 = arith.constant 0 : index
    %112 = vector.load %arg7[%c0_27, %c0_28] : memref<32x256xf32, #tpu.memory_space<vmem>>, vector<32x256xf32>
    tpu.vector_store %arg7[%c0_27, %c0_28], %99 {strides = array<i32>} : memref<32x256xf32, #tpu.memory_space<vmem>>, vector<32x256xf32>,
    %c0_29 = arith.constant 0 : index
    %c0_30 = arith.constant 0 : index
    %113 = vector.load %arg8[%c0_29, %c0_30] : memref<1x256xf32, #tpu.memory_space<vmem>>, vector<1x256xf32>
    tpu.vector_store %arg8[%c0_29, %c0_30], %111 {strides = array<i32>} : memref<1x256xf32, #tpu.memory_space<vmem>>, vector<1x256xf32>,
    return
  }
  func.func @transform_0(%arg0: i32, %arg1: memref<4xf32, #tpu.memory_space<smem>>, %arg2: memref<4xf32, #tpu.memory_space<smem>>) -> (i32, i32) {
    %c0_i32 = arith.constant 0 : i32
    %c0_i32_0 = arith.constant 0 : i32
    return %c0_i32, %arg0 : i32, i32
  }
  func.func @transform_1(%arg0: i32, %arg1: memref<4xf32, #tpu.memory_space<smem>>, %arg2: memref<4xf32, #tpu.memory_space<smem>>) -> (i32, i32) {
    %c0_i32 = arith.constant 0 : i32
    %c0_i32_0 = arith.constant 0 : i32
    return %c0_i32, %arg0 : i32, i32
  }
  func.func @transform_2(%arg0: i32, %arg1: memref<4xf32, #tpu.memory_space<smem>>, %arg2: memref<4xf32, #tpu.memory_space<smem>>) -> (i32, i32) {
    %c0_i32 = arith.constant 0 : i32
    %c0_i32_0 = arith.constant 0 : i32
    %c0_i32_1 = arith.constant 0 : i32
    return %c0_i32, %c0_i32_0 : i32, i32
  }
  func.func @transform_3(%arg0: i32, %arg1: memref<4xf32, #tpu.memory_space<smem>>, %arg2: memref<4xf32, #tpu.memory_space<smem>>) -> (i32, i32) {
    %c0_i32 = arith.constant 0 : i32
    %c0_i32_0 = arith.constant 0 : i32
    %c0_i32_1 = arith.constant 0 : i32
    return %c0_i32, %c0_i32_0 : i32, i32
  }
  func.func @transform_4(%arg0: i32, %arg1: memref<4xf32, #tpu.memory_space<smem>>, %arg2: memref<4xf32, #tpu.memory_space<smem>>) -> (i32, i32) {
    %c0_i32 = arith.constant 0 : i32
    %c0_i32_0 = arith.constant 0 : i32
    return %c0_i32, %arg0 : i32, i32
  }
  func.func @transform_5(%arg0: i32, %arg1: memref<4xf32, #tpu.memory_space<smem>>, %arg2: memref<4xf32, #tpu.memory_space<smem>>) -> (i32, i32) {
    %c0_i32 = arith.constant 0 : i32
    %c0_i32_0 = arith.constant 0 : i32
    return %c0_i32, %arg0 : i32, i32
  }
}

</mosaic_0001>

<bundles_post_ra>
// kernel: tpu_custom_call.1
= control target key start
LH: loop header
LB: loop body
LE: loop exit
PB: predicated region body
PF: predicated region fallthrough
CT: control target
= control target key end

     0   :  { %s1739_s0 = inlined_call_operand.vmem [shape: f32[4], index: 0, kind: input, shape index: {}]   ;;  %s1740_s2 = inlined_call_operand.vmem [shape: f32[512,32], index: 2, kind: input, shape index: {}]   ;;  %s1741_s3 = inlined_call_operand.vmem [shape: f32[1,512], index: 3, kind: input, shape index: {}]   ;;  %s1742_s4 = inlined_call_operand.vmem [shape: f32[32,4], index: 4, kind: input, shape index: {}]   ;;  %s1743_s5 = inlined_call_operand.vmem [shape: f32[32,4], index: 5, kind: input, shape index: {}]   ;;  %s1744_s6 = inlined_call_operand.vmem [shape: f32[512,32], index: 6, kind: output, shape index: {0}]   ;;  %s1745_s7 = inlined_call_operand.hbm [shape: f32[1,512], index: 7, kind: output, shape index: {1}]   ;;  %s1746_s1 = inlined_call_operand.vmem [shape: f32[4], index: 1, kind: input, shape index: {}]  }
   0x1   :  { %s13_s26 = sshll.u32 %s1739_s0, 4  ;;  %s17_s29 = sshll.u32 %s1746_s1, 4  ;;  %s14_s26 = int_to_ptr.vmem [resolvable:$true] %s13_s26  ;;  %s18_s29 = int_to_ptr.vmem [resolvable:$true] %s17_s29 }
   0x2   :  { %s1180_s30 = scalar_lea.vmem %s14_s26, 16  ;;  %p1185_p1 = scmp.lt.s32.totalorder %s14_s26, %s14_s26 }
   0x3   :  { %p1181_p0 = scmp.ne.s32.totalorder %s14_s26, %s1180_s30  ;;  %p1186_p2 = scmp.lt.s32.totalorder %s1180_s30, %s1180_s30 }
   0x5   :  { %p1187_p3 = por %p1186_p2, %p1185_p1 }
   0x7   :  { %p1188_p4 = pnand %p1187_p3, %p1181_p0 }
   0x9   :  { %1191 = shalt.err (!%p1188_p4)  }
   0xa   :  { %s1270_s8 = smov [#allocation3]   ;;  %s1192_s9 = scalar_lea.vmem %s18_s29, 16 }
   0xb   :  { %16 = dma.vmem_to_smem %s14_s26, 16, %s1270_s8, [#allocation2] }
   0xc   :  { %p1193_p5 = scmp.ne.s32.totalorder %s18_s29, %s1192_s9  ;;  %p1197_p6 = scmp.lt.s32.totalorder %s18_s29, %s18_s29 }
   0xd   :  { %p1198_p7 = scmp.lt.s32.totalorder %s1192_s9, %s1192_s9 }
   0xf   :  { %p1199_p8 = por %p1198_p7, %p1197_p6 }
  0x11   :  { %p1200_p9 = pnand %p1199_p8, %p1193_p5 }
  0x13   :  { %1203 = shalt.err (!%p1200_p9)  }
  0x14   :  { %s1271_s0 = smov [#allocation4]  }
  0x15   :  { %20 = dma.vmem_to_smem %s18_s29, 16, %s1271_s0, [#allocation2] }
  0x16   :  { %1248 = dma.done.wait [#allocation2], 32 }
  0x17   :  { %1249 = vsyncadd [#allocation2], 4294967264 }
  0x18   :  { %22 = sfence }
  0x19   :  { %23 = vsyncpa [#allocation6], 0 }
  0x1a   :  { %25 = vsyncpa [#allocation6 + $0x1], 0  ;;  %s1324_s1 = smov 0   ;;  %s1326_s10 = smov 0  }
  0x1b   :  { %s1328_s11 = smov 0   ;;  %s1330_s12 = smov 0  }
  0x1c LB: > { %s1345_s13 = sadd.s32 4294967295, %s1268_s12   ;;  %s1071_s14 = sadd.s32 4294967294, %s1268_s12   ;;  %s1268_s12 = sphi %s1330_s12, %s1752_s12   ;;  %s1264_s11 = sphi %s1328_s11, %s1751_s11   ;;  %s1260_s10 = sphi %s1326_s10, %s1750_s10   ;;  %s1256_s1 = sphi %s1324_s1, %s1749_s1  }
  0x1d   : > { %s1349_s15 = sadd.s32 1, %s1268_s12   ;;  %s158_s16 = sadd.s32 1, %s1264_s11 }
  0x1e   : > { %s155_s17 = ssub.s32 %s1268_s12, %s1349_s15  ;;  %p168_p10 = scmp.ne.s32.totalorder %s1264_s11, %s1260_s10 }
  0x1f   : > { %p156_p11 = scmp.eq.s32.totalorder %s155_s17, 0  ;;  %p169_p12 = scmp.eq.s32.totalorder %s1345_s13, 1 }
  0x20   : > { %p174_p13 = scmp.ne.s32.totalorder %s1260_s10, %s1256_s1  ;;  %p175_p0 = scmp.eq.s32.totalorder %s1071_s14, 1 }
  0x21   : > { %s1360_s18 = scalar_select %p156_p11, %s1264_s11, %s158_s16  }
  0x22   : > { %p1362_p1 = por %p169_p12, %p168_p10  ;;  %p1366_p2 = por %p175_p0, %p174_p13 }
  0x23   : > { %p1074_p3 = scmp.ge.s32.totalorder %s1268_s12, 1  ;;  %p216_p4 = scmp.lt.s32.totalorder %s1268_s12, 3 }
  0x25   : > { %p217_p5 = pnand %p1074_p3, %p216_p4 }
  0x26   : > { %v1375_v0 = vld [vmem:[%s1743_s5 + $0x10] sm:$0xff] (!%p217_p5)  ;;  %v1380_v1 = vld [vmem:[%s1743_s5] sm:$0xff] (!%p217_p5)  ;;  %v1272_v2 = vmov (!%p217_p5), 0   ;;  %v1387_v3 = vld [vmem:[%s1743_s5 + $0x18] sm:$0xff] (!%p217_p5)  ;;  %s1397_s29 = sshll.u32 (!%p217_p5), %s1345_s13, 5  ;;  %v1273_v41 = vmov (!%p217_p5), 1  }
  0x27   : > { %220 = sbr.rel (%p217_p5) target bundleno = 616 (0x268), region = 36  ;;  %1141 = vset.pattern.permute.xlu1 (!%p217_p5), %v1272_v2  ;;  %1140 = vset.pattern.permute.xlu0 (!%p217_p5), %v1272_v2  ;;  %v1392_v4 = vld [vmem:[%s1743_s5 + $0x8] sm:$0xff] (!%p217_p5)  ;;  %p254_p6 = scmp.lt.s32.totalorder (!%p217_p5), %s1397_s29, 63  ;;  %v1449_v38 = vld [vmem:[%s1742_s4] sm:$0xff] (!%p217_p5)  ;;  %v1455_v39 = vld [vmem:[%s1742_s4 + $0x18] sm:$0xff] (!%p217_p5)  ;;  %v1274_v44 = vmov (!%p217_p5), 2  }
  0x28   : > { %390 = vperm.xlu1 (!%p217_p5), %1141, %v1375_v0   ;;  %380 = vperm.xlu0 (!%p217_p5), %1140, %v1380_v1   ;;  %v369_v37 = vld [vmem:[%s1742_s4 + $0x8] sm:$0xff] (!%p217_p5)  ;;  %v1460_v40 = vld [vmem:[%s1742_s4 + $0x10] sm:$0xff] (!%p217_p5)  ;;  %v1275_v55 = vmov (!%p217_p5), 3   ;;  %s1496_s27 = sld [smem:[#allocation3]] (!%p217_p5)  ;;  %s1081_s9 = sld [smem:[#allocation3 + $0x1]] (!%p217_p5) }
  0x29   : > { %s377_s28 = sld [smem:[#allocation4]] (!%p217_p5)  ;;  %s1535_s0 = sld [smem:[#allocation4 + $0x1]] (!%p217_p5) }
  0x2a   : > { %s1078_s16 = sshll.u32 (!%p217_p5), %s1345_s13, 1  ;;  %s1085_s22 = sld [smem:[#allocation3 + $0x3]] (!%p217_p5) }
  0x2b   : > { %p260_p7 = scmp.lt.s32.totalorder (!%p217_p5), %s1078_s16, 3  ;;  %s1084_s23 = sld [smem:[#allocation4 + $0x2]] (!%p217_p5) }
  0x2c   : > { %395 = vperm.xlu1 (!%p217_p5), %1141, %v1387_v3   ;;  %385 = vperm.xlu0 (!%p217_p5), %1140, %v1392_v4   ;;  %s1086_s24 = sld [smem:[#allocation4 + $0x3]] (!%p217_p5)  ;;  %s250_s25 = sand.u32 (!%p217_p5), 1, %s1260_s10  }
  0x2d   : > { %s1075_s26 = sshll.u32 (!%p217_p5), %s250_s25, 1  ;;  %s1277_s17 = smov (!%p217_p5), [#allocation5]  }
  0x2e   : > { %s1401_s30 = scalar_select %p254_p6, %s1397_s29, 63 }
  0x2f   : > { %s1754_s16 = smov (!%p260_p7, %s1078_s16), 3 }
  0x30   : > { %s1077_s8 = sshll.u32 %s1401_s30, 3  ;;  %s262_s21 = scalar_lea.vmem %s1741_s3, %s1754_s16 }
  0x31   : > { %s1409_s14 = scalar_lea.vmem %s1740_s2, %s1077_s8  ;;  %s960_s16 = scalar_lea.sflag [#allocation6], %s250_s25 }
  0x32   : > { %v271_v5 = vld [vmem:[%s1409_s14] sm:$0xff]  ;;  %v272_v6 = vld [vmem:[%s1409_s14 + $0x8] sm:$0xff]  ;;  %v273_v7 = vld [vmem:[%s1409_s14 + $0x10] sm:$0xff] }
  0x33   : > { %v287_v8 = vld [vmem:[%s1409_s14 + $0x80] sm:$0xff]  ;;  %v274_v9 = vld [vmem:[%s1409_s14 + $0x18] sm:$0xff]  ;;  %v288_v10 = vld [vmem:[%s1409_s14 + $0x88] sm:$0xff] }
  0x34   : > { %v275_v11 = vld [vmem:[%s1409_s14 + $0x20] sm:$0xff]  ;;  %v289_v12 = vld [vmem:[%s1409_s14 + $0x90] sm:$0xff]  ;;  %v276_v13 = vld [vmem:[%s1409_s14 + $0x28] sm:$0xff] }
  0x35   : > { %v290_v14 = vld [vmem:[%s1409_s14 + $0x98] sm:$0xff]  ;;  %v277_v15 = vld [vmem:[%s1409_s14 + $0x30] sm:$0xff]  ;;  %v291_v16 = vld [vmem:[%s1409_s14 + $0xa0] sm:$0xff] }
  0x36   : > { %v278_v17 = vld [vmem:[%s1409_s14 + $0x38] sm:$0xff]  ;;  %v292_v18 = vld [vmem:[%s1409_s14 + $0xa8] sm:$0xff]  ;;  %v279_v19 = vld [vmem:[%s1409_s14 + $0x40] sm:$0xff] }
  0x37   : > { %v293_v20 = vld [vmem:[%s1409_s14 + $0xb0] sm:$0xff]  ;;  %v280_v21 = vld [vmem:[%s1409_s14 + $0x48] sm:$0xff]  ;;  %v294_v22 = vld [vmem:[%s1409_s14 + $0xb8] sm:$0xff] }
  0x38   : > { %v281_v23 = vld [vmem:[%s1409_s14 + $0x50] sm:$0xff]  ;;  %v295_v24 = vld [vmem:[%s1409_s14 + $0xc0] sm:$0xff]  ;;  %v282_v25 = vld [vmem:[%s1409_s14 + $0x58] sm:$0xff] }
  0x39   : > { %v296_v26 = vld [vmem:[%s1409_s14 + $0xc8] sm:$0xff]  ;;  %v283_v27 = vld [vmem:[%s1409_s14 + $0x60] sm:$0xff]  ;;  %v297_v28 = vld [vmem:[%s1409_s14 + $0xd0] sm:$0xff] }
  0x3a   : > { %v284_v29 = vld [vmem:[%s1409_s14 + $0x68] sm:$0xff]  ;;  %v298_v30 = vld [vmem:[%s1409_s14 + $0xd8] sm:$0xff]  ;;  %v285_v31 = vld [vmem:[%s1409_s14 + $0x70] sm:$0xff] }
  0x3b   : > { %v299_v32 = vld [vmem:[%s1409_s14 + $0xe0] sm:$0xff]  ;;  %v286_v33 = vld [vmem:[%s1409_s14 + $0x78] sm:$0xff]  ;;  %v300_v34 = vld [vmem:[%s1409_s14 + $0xe8] sm:$0xff] }
  0x3c   : > { %v301_v35 = vld [vmem:[%s1409_s14 + $0xf0] sm:$0xff]  ;;  %v302_v36 = vld [vmem:[%s1409_s14 + $0xf8] sm:$0xff]  ;;  %s1083_s14 = sld [smem:[#allocation3 + $0x2]] }
  0x4a   : > { %303 = vxpose.xlu0.b32.start [1/16] (narrow) %v271_v5, 32 }
  0x4e   : > { %304 = vxpose.xlu0.b32.cont [2/16] (narrow) %v272_v6, 32 }
  0x52   : > { %305 = vxpose.xlu0.b32.cont [3/16] (narrow) %v273_v7, 32 }
  0x55   : > { %335 = vxpose.xlu1.b32.start [1/16] (narrow) %v287_v8, 32 }
  0x56   : > { %306 = vxpose.xlu0.b32.cont [4/16] (narrow) %v274_v9, 32 }
  0x59   : > { %336 = vxpose.xlu1.b32.cont [2/16] (narrow) %v288_v10, 32 }
  0x5a   : > { %307 = vxpose.xlu0.b32.cont [5/16] (narrow) %v275_v11, 32 }
  0x5d   : > { %337 = vxpose.xlu1.b32.cont [3/16] (narrow) %v289_v12, 32  ;;  %v424_v12 = vstv %s1496_s27  ;;  %s252_s27 = scalar_lea.vmem [#allocation5], %s1075_s26 }
  0x5e   : > { %308 = vxpose.xlu0.b32.cont [6/16] (narrow) %v276_v13, 32 }
  0x61   : > { %338 = vxpose.xlu1.b32.cont [4/16] (narrow) %v290_v14, 32 }
  0x62   : > { %309 = vxpose.xlu0.b32.cont [7/16] (narrow) %v277_v15, 32 }
  0x65   : > { %339 = vxpose.xlu1.b32.cont [5/16] (narrow) %v291_v16, 32 }
  0x66   : > { %310 = vxpose.xlu0.b32.cont [8/16] (narrow) %v278_v17, 32 }
  0x69   : > { %340 = vxpose.xlu1.b32.cont [6/16] (narrow) %v292_v18, 32 }
  0x6a   : > { %311 = vxpose.xlu0.b32.cont [9/16] (narrow) %v279_v19, 32 }
  0x6d   : > { %341 = vxpose.xlu1.b32.cont [7/16] (narrow) %v293_v20, 32 }
  0x6e   : > { %312 = vxpose.xlu0.b32.cont [10/16] (narrow) %v280_v21, 32 }
  0x71   : > { %342 = vxpose.xlu1.b32.cont [8/16] (narrow) %v294_v22, 32 }
  0x72   : > { %313 = vxpose.xlu0.b32.cont [11/16] (narrow) %v281_v23, 32 }
  0x75   : > { %343 = vxpose.xlu1.b32.cont [9/16] (narrow) %v295_v24, 32  ;;  %v469_v24 = vstv %s377_s28 }
  0x76   : > { %314 = vxpose.xlu0.b32.cont [12/16] (narrow) %v282_v25, 32 }
  0x79   : > { %344 = vxpose.xlu1.b32.cont [10/16] (narrow) %v296_v26, 32 }
  0x7a   : > { %315 = vxpose.xlu0.b32.cont [13/16] (narrow) %v283_v27, 32 }
  0x7d   : > { %345 = vxpose.xlu1.b32.cont [11/16] (narrow) %v297_v28, 32 }
  0x7e   : > { %316 = vxpose.xlu0.b32.cont [14/16] (narrow) %v284_v29, 32 }
  0x81   : > { %346 = vxpose.xlu1.b32.cont [12/16] (narrow) %v298_v30, 32 }
  0x82   : > { %317 = vxpose.xlu0.b32.cont [15/16] (narrow) %v285_v31, 32 }
  0x85   : > { %347 = vxpose.xlu1.b32.cont [13/16] (narrow) %v299_v32, 32 }
  0x86   : > { %318 = vxpose.xlu0.b32.end [16/16] (narrow) %v286_v33, 32 }
  0x89   : > { %348 = vxpose.xlu1.b32.cont [14/16] (narrow) %v300_v34, 32 }
  0x8d   : > { %349 = vxpose.xlu1.b32.cont [15/16] (narrow) %v301_v35, 32 }
  0x91   : > { %350 = vxpose.xlu1.b32.end [16/16] (narrow) %v302_v36, 32 }
  0xa7   : > { %v381_v42 = vpop.permute.xlu0 %380  ;;  %v391_v46 = vpop.permute.xlu1 %390 }
  0xab   : > { %v386_v43 = vpop.permute.xlu0 %385  ;;  %v396_v48 = vpop.permute.xlu1 %395 }
  0xaf   : > { %436 = vperm.xlu1 %1141, %v369_v37   ;;  %431 = vperm.xlu0 %1140, %v1449_v38  }
  0xb3   : > { %446 = vperm.xlu1 %1141, %v1455_v39   ;;  %441 = vperm.xlu0 %1140, %v1460_v40  }
  0xb7   : > { %1143 = vset.pattern.permute.xlu1 %v1273_v41  ;;  %1142 = vset.pattern.permute.xlu0 %v1273_v41 }
  0xb8   : > { %508 = vperm.xlu1 %1143, %v1392_v4   ;;  %504 = vperm.xlu0 %1142, %v1380_v1  }
  0xbc   : > { %512 = vperm.xlu1 %1143, %v1375_v0   ;;  %516 = vperm.xlu0 %1142, %v1387_v3  }
  0xc0   : > { %551 = vperm.xlu1 %1143, %v1449_v38   ;;  %555 = vperm.xlu0 %1142, %v369_v37  }
  0xc4   : > { %559 = vperm.xlu1 %1143, %v1460_v40   ;;  %563 = vperm.xlu0 %1142, %v1455_v39  }
  0xc8   : > { %1144 = vset.pattern.permute.xlu1 %v1274_v44  ;;  %1145 = vset.pattern.permute.xlu0 %v1274_v44 }
  0xc9   : > { %621 = vperm.xlu1 %1144, %v1380_v1   ;;  %625 = vperm.xlu0 %1145, %v1392_v4  }
  0xca   : > { %v1473_v45 = vpop.trf.xlu0 }
  0xcb   : > { %v398_v51 = vmul.f32 %v381_v42, %v1473_v45 }
  0xcd   : > { %629 = vperm.xlu1 %1144, %v1375_v0   ;;  %668 = vperm.xlu0 %1145, %v1449_v38  }
  0xce   : > { %v1477_v47 = vpop.trf.xlu0 }
  0xcf   : > { %v400_v49 = vmul.f32 %v386_v43, %v1477_v47 }
  0xd1   : > { %633 = vperm.xlu1 %1144, %v1387_v3   ;;  %676 = vperm.xlu0 %1145, %v1460_v40   ;;  %v406_v53 = vadd.f32 %v400_v49, %v398_v51 }
  0xd2   : > { %v1482_v50 = vpop.trf.xlu0 }
  0xd3   : > { %v402_v52 = vmul.f32 %v391_v46, %v1482_v50 }
  0xd5   : > { %v1486_v54 = vpop.trf.xlu1  ;;  %672 = vperm.xlu1 %1144, %v369_v37   ;;  %1146 = vset.pattern.permute.xlu0 %v1275_v55  ;;  %v407_v57 = vadd.f32 %v406_v53, %v402_v52 }
  0xd6   : > { %v1488_v56 = vpop.trf.xlu0  ;;  %738 = vperm.xlu0 %1146, %v1380_v1   ;;  %v399_v1 = vmul.f32 %v381_v42, %v1486_v54 }
  0xd7   : > { %v404_v58 = vmul.f32 %v396_v48, %v1488_v56 }
  0xd9   : > { %v408_v59 = vadd.f32 %v407_v57, %v404_v58  ;;  %v1492_v60 = vpop.trf.xlu1  ;;  %680 = vperm.xlu1 %1144, %v1455_v39  }
  0xda   : > { %750 = vperm.xlu0 %1146, %v1387_v3   ;;  %v401_v62 = vmul.f32 %v386_v43, %v1492_v60 }
  0xdb   : > { %v409_v61 = vrot.slane %v408_v59, 4 }
  0xdc   : > { %v415_v7 = vadd.f32 %v401_v62, %v399_v1 }
  0xdd   : > { %v410_v63 = vadd.f32 %v409_v61, %v408_v59  ;;  %v1499_v2 = vpop.trf.xlu1  ;;  %1147 = vset.pattern.permute.xlu1 %v1275_v55 }
  0xde   : > { %v403_v5 = vmul.f32 %v391_v46, %v1499_v2  ;;  %742 = vperm.xlu1 %1147, %v1392_v4   ;;  %789 = vperm.xlu0 %1146, %v369_v37  }
  0xdf   : > { %v411_v6 = vrot.slane %v410_v63, 2 }
  0xe0   : > { %v416_v9 = vadd.f32 %v415_v7, %v403_v5 }
  0xe1   : > { %v412_v3 = vadd.f32 %v411_v6, %v410_v63  ;;  %v1504_v8 = vpop.trf.xlu1 }
  0xe2   : > { %v405_v10 = vmul.f32 %v396_v48, %v1504_v8  ;;  %746 = vperm.xlu1 %1147, %v1375_v0   ;;  %797 = vperm.xlu0 %1146, %v1455_v39  }
  0xe3   : > { %v413_v11 = vrot.slane %v412_v3, 1 }
  0xe4   : > { %v417_v13 = vadd.f32 %v416_v9, %v405_v10 }
  0xe5   : > { %v414_v14 = vadd.f32 %v413_v11, %v412_v3 }
  0xe6   : > { %v418_v15 = vrot.slane %v417_v13, 4  ;;  %785 = vperm.xlu1 %1147, %v1449_v38  }
  0xe7   : > { %v425_v4 = vadd.f32 %v424_v12, %v414_v14 }
  0xe8   : > { %v419_v16 = vadd.f32 %v418_v15, %v417_v13 }
  0xe9   : > { %1148 = vtanh.f32 %v425_v4 }
  0xea   : > { %v420_v17 = vrot.slane %v419_v16, 2  ;;  %793 = vperm.xlu1 %1147, %v1460_v40  }
  0xec   : > { %v421_v18 = vadd.f32 %v420_v17, %v419_v16 }
  0xee   : > { %v422_v19 = vrot.slane %v421_v18, 1 }
  0xf0   : > { %v423_v20 = vadd.f32 %v422_v19, %v421_v18 }
  0xf2   : > { %v426_v0 = vadd.f32 %v424_v12, %v423_v20 }
  0xf3   : > { %v1149_v21 = vpop.eup %1148 }
  0xf4   : > { %1150 = vtanh.f32 %v426_v0  ;;  %v465_v22 = vmul.f32 %v1149_v21, %v1149_v21 }
  0xf6   : > { %v467_v23 = vsub.f32 1.0, %v465_v22 }
  0xf8   : > { %v470_v25 = vmul.f32 %v469_v24, %v467_v23 }
  0xfa   : > { %v472_v26 = vadd.f32 1.0, %v470_v25  ;;  %v545_v25 = vstv %s1081_s9 }
  0xfc   : > { %v474_v30 = vand.u32 2147483647, %v472_v26 }
  0xfe   : > { %v1151_v27 = vpop.eup %1150  ;;  %v476_v33 = vadd.f32 1e-08, %v474_v30 }
  0xff   : > { %v466_v28 = vmul.f32 %v1151_v27, %v1151_v27 }
 0x100   : > { %1152 = vlog2.f32 %v476_v33 }
 0x101   : > { %v468_v29 = vsub.f32 1.0, %v466_v28 }
 0x103   : > { %v471_v31 = vmul.f32 %v469_v24, %v468_v29 }
 0x105   : > { %v473_v32 = vadd.f32 1.0, %v471_v31 }
 0x107   : > { %v475_v34 = vand.u32 2147483647, %v473_v32 }
 0x109   : > { %v477_v35 = vadd.f32 1e-08, %v475_v34 }
 0x10a   : > { %v1153_v36 = vpop.eup %1152 }
 0x10b   : > { %1154 = vlog2.f32 %v477_v35  ;;  %v1512_v38 = vmul.f32 0.6931472, %v1153_v36 }
 0x115   : > { %v1155_v37 = vpop.eup %1154 }
 0x116   : > { %v1514_v39 = vmul.f32 0.6931472, %v1155_v37 }
 0x118   : > { %v484_v40 = vcombine.low %v1512_v38, %v1514_v39 }
 0x12e   : > { %v437_v41 = vpop.permute.xlu1 %436  ;;  %v432_v42 = vpop.permute.xlu0 %431 }
 0x12f   : > { %v451_v43 = vmul.f32 %v1149_v21, %v437_v41  ;;  %v452_v44 = vmul.f32 %v1151_v27, %v437_v41  ;;  %v449_v46 = vmul.f32 %v1149_v21, %v432_v42  ;;  %v450_v48 = vmul.f32 %v1151_v27, %v432_v42 }
 0x131   : > { %v1519_v52 = vadd.f32 %v452_v44, %v1492_v60  ;;  %v1522_v53 = vadd.f32 %v451_v43, %v1477_v47  ;;  %v457_v58 = vadd.f32 %v449_v46, %v1473_v45  ;;  %v1526_v59 = vadd.f32 %v450_v48, %v1486_v54 }
 0x132   : > { %v447_v49 = vpop.permute.xlu1 %446  ;;  %v442_v51 = vpop.permute.xlu0 %441 }
 0x133   : > { %v453_v55 = vmul.f32 %v1149_v21, %v442_v51  ;;  %v454_v57 = vmul.f32 %v1151_v27, %v442_v51  ;;  %v455_v61 = vmul.f32 %v1149_v21, %v447_v49  ;;  %v456_v62 = vmul.f32 %v1151_v27, %v447_v49 }
 0x135   : > { %v461_v47 = vadd.f32 %v453_v55, %v1482_v50  ;;  %v462_v3 = vadd.f32 %v454_v57, %v1499_v2  ;;  %v463_v45 = vadd.f32 %v455_v61, %v1488_v56  ;;  %v464_v54 = vadd.f32 %v456_v62, %v1504_v8 }
 0x137   : > { %v509_v63 = vpop.permute.xlu1 %508  ;;  %v505_v1 = vpop.permute.xlu0 %504 }
 0x138   : > { %v521_v5 = vmul.f32 %v509_v63, %v1522_v53  ;;  %v522_v6 = vmul.f32 %v509_v63, %v1519_v52  ;;  %v519_v60 = vmul.f32 %v505_v1, %v457_v58  ;;  %v520_v7 = vmul.f32 %v505_v1, %v1526_v59 }
 0x13a   : > { %v527_v11 = vadd.f32 %v521_v5, %v519_v60  ;;  %v536_v12 = vadd.f32 %v522_v6, %v520_v7 }
 0x13b   : > { %v513_v9 = vpop.permute.xlu1 %512  ;;  %v517_v10 = vpop.permute.xlu0 %516 }
 0x13c   : > { %v523_v13 = vmul.f32 %v513_v9, %v461_v47  ;;  %v524_v14 = vmul.f32 %v513_v9, %v462_v3  ;;  %v525_v16 = vmul.f32 %v517_v10, %v463_v45  ;;  %v526_v17 = vmul.f32 %v517_v10, %v464_v54 }
 0x13e   : > { %v528_v15 = vadd.f32 %v527_v11, %v523_v13  ;;  %v537_v4 = vadd.f32 %v536_v12, %v524_v14  ;;  %v586_v13 = vstv %s1535_s0  ;;  %s1632_s0 = scalar_lea.hbm %s1745_s7, %s1397_s29 }
 0x13f   : > { %v552_v28 = vpop.permute.xlu1 %551  ;;  %v556_v32 = vpop.permute.xlu0 %555 }
 0x140   : > { %v529_v18 = vadd.f32 %v528_v15, %v525_v16  ;;  %v538_v19 = vadd.f32 %v537_v4, %v526_v17 }
 0x142   : > { %v530_v20 = vrot.slane %v529_v18, 4  ;;  %v539_v50 = vrot.slane %v538_v19, 4 }
 0x143   : > { %v560_v31 = vpop.permute.xlu1 %559  ;;  %v564_v35 = vpop.permute.xlu0 %563 }
 0x144   : > { %v531_v2 = vadd.f32 %v530_v20, %v529_v18  ;;  %v540_v0 = vadd.f32 %v539_v50, %v538_v19 }
 0x146   : > { %v532_v21 = vrot.slane %v531_v2, 2  ;;  %v541_v56 = vrot.slane %v540_v0, 2 }
 0x148   : > { %v533_v22 = vadd.f32 %v532_v21, %v531_v2  ;;  %v542_v8 = vadd.f32 %v541_v56, %v540_v0  ;;  %v622_v33 = vpop.permute.xlu1 %621  ;;  %v626_v5 = vpop.permute.xlu0 %625 }
 0x14a   : > { %v534_v23 = vrot.slane %v533_v22, 1  ;;  %v543_v24 = vrot.slane %v542_v8, 1 }
 0x14c   : > { %v535_v26 = vadd.f32 %v534_v23, %v533_v22  ;;  %v544_v27 = vadd.f32 %v543_v24, %v542_v8  ;;  %v630_v51 = vpop.permute.xlu1 %629 }
 0x14e   : > { %v546_v29 = vadd.f32 %v545_v25, %v535_v26  ;;  %v547_v30 = vadd.f32 %v545_v25, %v544_v27 }
 0x150   : > { %1156 = vtanh.f32 %v546_v29  ;;  %v634_v11 = vpop.permute.xlu1 %633 }
 0x151   : > { %1158 = vtanh.f32 %v547_v30 }
 0x15a   : > { %v1157_v34 = vpop.eup %1156 }
 0x15b   : > { %v1159_v36 = vpop.eup %1158  ;;  %v566_v37 = vmul.f32 %v1157_v34, %v552_v28  ;;  %v568_v41 = vmul.f32 %v1157_v34, %v556_v32  ;;  %v570_v42 = vmul.f32 %v1157_v34, %v560_v31  ;;  %v572_v43 = vmul.f32 %v1157_v34, %v564_v35 }
 0x15c   : > { %v567_v44 = vmul.f32 %v1159_v36, %v552_v28  ;;  %v569_v46 = vmul.f32 %v1159_v36, %v556_v32  ;;  %v571_v48 = vmul.f32 %v1159_v36, %v560_v31  ;;  %v573_v49 = vmul.f32 %v1159_v36, %v564_v35 }
 0x15d   : > { %v1537_v55 = vadd.f32 %v566_v37, %v457_v58  ;;  %v1539_v57 = vadd.f32 %v570_v42, %v461_v47  ;;  %v1542_v61 = vadd.f32 %v568_v41, %v1522_v53  ;;  %v1553_v60 = vadd.f32 %v572_v43, %v463_v45 }
 0x15e   : > { %v1545_v62 = vadd.f32 %v567_v44, %v1526_v59  ;;  %v1547_v63 = vadd.f32 %v571_v48, %v462_v3  ;;  %v1550_v1 = vadd.f32 %v569_v46, %v1519_v52  ;;  %v1557_v53 = vadd.f32 %v573_v49, %v464_v54  ;;  %v673_v46 = vpop.permute.xlu1 %672  ;;  %v669_v49 = vpop.permute.xlu0 %668 }
 0x15f   : > { %v636_v6 = vmul.f32 %v622_v33, %v1537_v55  ;;  %v638_v58 = vmul.f32 %v626_v5, %v1542_v61  ;;  %v640_v47 = vmul.f32 %v630_v51, %v1539_v57  ;;  %v582_v9 = vmul.f32 %v1157_v34, %v1157_v34 }
 0x160   : > { %v637_v7 = vmul.f32 %v622_v33, %v1545_v62  ;;  %v639_v59 = vmul.f32 %v626_v5, %v1550_v1  ;;  %v583_v10 = vmul.f32 %v1159_v36, %v1159_v36  ;;  %v641_v52 = vmul.f32 %v630_v51, %v1547_v63 }
 0x161   : > { %v644_v3 = vadd.f32 %v638_v58, %v636_v6  ;;  %v642_v45 = vmul.f32 %v634_v11, %v1553_v60  ;;  %v584_v15 = vsub.f32 1.0, %v582_v9  ;;  %v643_v54 = vmul.f32 %v634_v11, %v1557_v53 }
 0x162   : > { %v653_v12 = vadd.f32 %v639_v59, %v637_v7  ;;  %v585_v4 = vsub.f32 1.0, %v583_v10  ;;  %v1276_v31 = vmov 1966171168   ;;  %v488_v33 = vlaneseq  ;;  %v681_v7 = vpop.permute.xlu1 %680 }
 0x163   : > { %v645_v14 = vadd.f32 %v644_v3, %v640_v47  ;;  %v587_v18 = vmul.f32 %v586_v13, %v584_v15  ;;  %v486_v32 = vunpack.c.l.s4 %v1276_v31  ;;  %v662_v34 = vstv %s1083_s14  ;;  %v677_v3 = vpop.permute.xlu0 %676  ;;  %s978_s14 = sshll.u32 %s252_s27, 4  ;;  %s979_s14 = int_to_ptr.vmem [resolvable:$true] %s978_s14 }
 0x164   : > { %v654_v16 = vadd.f32 %v653_v12, %v641_v52  ;;  %v588_v19 = vmul.f32 %v586_v13, %v585_v4  ;;  %v489_v43 = vshrl.u32 %v488_v33, 7  ;;  %vm951_vm0 = vcmp.lt.s32.totalorder %v488_v33, 256  ;;  %s1204_s13 = scalar_lea.vmem %s979_s14, 32 }
 0x165   : > { %v646_v17 = vadd.f32 %v645_v14, %v642_v45  ;;  %v589_v2 = vadd.f32 1.0, %v587_v18  ;;  %v487_v42 = vunpack.c.0.s8 %v486_v32  ;;  %p1205_p8 = scmp.ne.s32.totalorder %s979_s14, %s1204_s13 }
 0x166   : > { %v655_v20 = vadd.f32 %v654_v16, %v643_v54  ;;  %v590_v0 = vadd.f32 1.0, %v588_v19  ;;  %v743_v52 = vpop.permute.xlu1 %742  ;;  %v367_v16 = vld [vmem:[%s262_s21] sm:$0x3]  ;;  %s1208_s21 = sshll.u32 %s1277_s17, 4  ;;  %s1209_s21 = int_to_ptr.vmem [resolvable:$false] %s1208_s21 }
 0x167   : > { %v647_v50 = vrot.slane %v646_v17, 4  ;;  %v591_v22 = vand.u32 2147483647, %v589_v2  ;;  %v1567_v51 = vsub.s32 %v487_v42, %v489_v43  ;;  %v739_v54 = vpop.permute.xlu0 %738  ;;  %p1206_p9 = pnand %p1205_p8, %p1362_p1  ;;  %p1211_p11 = scmp.lt.s32.totalorder %s979_s14, %s1209_s21 }
 0x168   : > { %v656_v21 = vrot.slane %v655_v20, 4  ;;  %v592_v8 = vand.u32 2147483647, %v590_v0 }
 0x169   : > { %v648_v56 = vadd.f32 %v647_v50, %v646_v17  ;;  %v593_v25 = vadd.f32 1e-08, %v591_v22  ;;  %v491_v59 = vrot.slane %v484_v40, %v1567_v51  ;;  %p1207_p10 = pneg %p1206_p9 }
 0x16a   : > { %v657_v23 = vadd.f32 %v656_v21, %v655_v20  ;;  %v594_v26 = vadd.f32 1e-08, %v592_v8 }
 0x16b   : > { %v649_v24 = vrot.slane %v648_v56, 2  ;;  %1160 = vlog2.f32 %v593_v25  ;;  %v498_v11 = vrot.slane %v491_v59, %v1567_v51 }
 0x16c   : > { %v658_v27 = vrot.slane %v657_v23, 2  ;;  %1162 = vlog2.f32 %v594_v26  ;;  %v751_v26 = vpop.permute.xlu0 %750 }
 0x16d   : > { %v650_v28 = vadd.f32 %v649_v24, %v648_v56 }
 0x16e   : > { %v659_v29 = vadd.f32 %v658_v27, %v657_v23 }
 0x16f   : > { %v651_v30 = vrot.slane %v650_v28, 1 }
 0x170   : > { %v660_v35 = vrot.slane %v659_v29, 1 }
 0x171   : > { %v652_v36 = vadd.f32 %v651_v30, %v650_v28 }
 0x172   : > { %v661_v37 = vadd.f32 %v660_v35, %v659_v29 }
 0x173   : > { %v663_v41 = vadd.f32 %v662_v34, %v652_v36 }
 0x174   : > { %v664_v44 = vadd.f32 %v662_v34, %v661_v37 }
 0x175   : > { %1164 = vtanh.f32 %v663_v41  ;;  %v1161_v48 = vpop.eup %1160 }
 0x176   : > { %1166 = vtanh.f32 %v664_v44  ;;  %v1163_v5 = vpop.eup %1162  ;;  %v596_v6 = vmul.f32 0.6931472, %v1161_v48  ;;  %v779_v48 = vstv %s1085_s22  ;;  %s1210_s22 = scalar_lea.vmem %s1209_s21, 64 }
 0x177   : > { %v598_v58 = vmul.f32 0.6931472, %v1163_v5  ;;  %p1212_p12 = scmp.lt.s32.totalorder %s1210_s22, %s1204_s13 }
 0x179   : > { %v601_v47 = vcombine.low %v596_v6, %v598_v58  ;;  %p1213_p13 = por %p1212_p12, %p1211_p11 }
 0x17b   : > { %v608_v9 = vrot.slane %v601_v47, %v1567_v51  ;;  %p1214_p0 = pnand %p1213_p13, %p1207_p10 }
 0x17d   : > { %v615_v20 = vrot.slane %v608_v9, %v1567_v51 }
 0x17f   : > { %v1165_v10 = vpop.eup %1164 }
 0x180   : > { %v1167_v12 = vpop.eup %1166  ;;  %v689_v13 = vmul.f32 %v1165_v10, %v681_v7  ;;  %v683_v45 = vmul.f32 %v1165_v10, %v669_v49  ;;  %v687_v14 = vmul.f32 %v1165_v10, %v677_v3  ;;  %v685_v15 = vmul.f32 %v1165_v10, %v673_v46 }
 0x181   : > { %v690_v4 = vmul.f32 %v1167_v12, %v681_v7  ;;  %v684_v38 = vmul.f32 %v1167_v12, %v669_v49  ;;  %v688_v39 = vmul.f32 %v1167_v12, %v677_v3  ;;  %v686_v40 = vmul.f32 %v1167_v12, %v673_v46 }
 0x182   : > { %v1579_v17 = vadd.f32 %v685_v15, %v1542_v61  ;;  %v1582_v18 = vadd.f32 %v683_v45, %v1537_v55  ;;  %v1585_v19 = vadd.f32 %v687_v14, %v1539_v57  ;;  %v1600_v55 = vadd.f32 %v689_v13, %v1553_v60 }
 0x183   : > { %v1589_v50 = vadd.f32 %v686_v40, %v1550_v1  ;;  %v1592_v2 = vadd.f32 %v684_v38, %v1545_v62  ;;  %v1595_v0 = vadd.f32 %v688_v39, %v1547_v63  ;;  %v500_v57 = vsub.f32 %v367_v16, %v498_v11  ;;  %v747_v1 = vpop.permute.xlu1 %746  ;;  %v790_v40 = vpop.permute.xlu0 %789 }
 0x184   : > { %v755_v61 = vmul.f32 %v743_v52, %v1579_v17  ;;  %v753_v21 = vmul.f32 %v739_v54, %v1582_v18  ;;  %v1605_v8 = vadd.f32 %v690_v4, %v1557_v53  ;;  %v757_v63 = vmul.f32 %v747_v1, %v1585_v19 }
 0x185   : > { %v756_v56 = vmul.f32 %v743_v52, %v1589_v50  ;;  %v754_v22 = vmul.f32 %v739_v54, %v1592_v2  ;;  %v1608_v23 = vsub.f32 %v500_v57, %v615_v20  ;;  %v758_v25 = vmul.f32 %v747_v1, %v1595_v0 }
 0x186   : > { %v761_v62 = vadd.f32 %v755_v61, %v753_v21  ;;  %v759_v27 = vmul.f32 %v751_v26, %v1600_v55  ;;  %v760_v29 = vmul.f32 %v751_v26, %v1605_v8  ;;  %v699_v41 = vmul.f32 %v1165_v10, %v1165_v10 }
 0x187   : > { %v770_v24 = vadd.f32 %v756_v56, %v754_v22  ;;  %v700_v43 = vmul.f32 %v1167_v12, %v1167_v12  ;;  %v703_v7 = vstv %s1084_s23  ;;  %v786_v14 = vpop.permute.xlu1 %785  ;;  %v820_v1 = vstv %s1086_s24 }
 0x188   : > { %v762_v60 = vadd.f32 %v761_v62, %v757_v63  ;;  %v701_v5 = vsub.f32 1.0, %v699_v41 }
 0x189   : > { %v771_v28 = vadd.f32 %v770_v24, %v758_v25  ;;  %v702_v58 = vsub.f32 1.0, %v700_v43 }
 0x18a   : > { %v763_v30 = vadd.f32 %v762_v60, %v759_v27  ;;  %v704_v9 = vmul.f32 %v703_v7, %v701_v5  ;;  %v798_v27 = vpop.permute.xlu0 %797 }
 0x18b   : > { %v772_v31 = vadd.f32 %v771_v28, %v760_v29  ;;  %v705_v52 = vmul.f32 %v703_v7, %v702_v58  ;;  %v794_v22 = vpop.permute.xlu1 %793 }
 0x18c   : > { %v764_v32 = vrot.slane %v763_v30, 4  ;;  %v706_v11 = vadd.f32 1.0, %v704_v9 }
 0x18d   : > { %v773_v53 = vrot.slane %v772_v31, 4  ;;  %v707_v13 = vadd.f32 1.0, %v705_v52 }
 0x18e   : > { %v765_v34 = vadd.f32 %v764_v32, %v763_v30  ;;  %v708_v10 = vand.u32 2147483647, %v706_v11 }
 0x18f   : > { %v774_v35 = vadd.f32 %v773_v53, %v772_v31  ;;  %v709_v45 = vand.u32 2147483647, %v707_v13 }
 0x190   : > { %v766_v36 = vrot.slane %v765_v34, 2  ;;  %v710_v38 = vadd.f32 1e-08, %v708_v10 }
 0x191   : > { %v775_v37 = vrot.slane %v774_v35, 2  ;;  %v711_v54 = vadd.f32 1e-08, %v709_v45 }
 0x192   : > { %v767_v42 = vadd.f32 %v766_v36, %v765_v34 }
 0x193   : > { %v776_v44 = vadd.f32 %v775_v37, %v774_v35 }
 0x194   : > { %v768_v46 = vrot.slane %v767_v42, 1 }
 0x195   : > { %v777_v49 = vrot.slane %v776_v44, 1 }
 0x196   : > { %v769_v6 = vadd.f32 %v768_v46, %v767_v42 }
 0x197   : > { %v778_v59 = vadd.f32 %v777_v49, %v776_v44 }
 0x198   : > { %v780_v47 = vadd.f32 %v779_v48, %v769_v6 }
 0x199   : > { %v781_v3 = vadd.f32 %v779_v48, %v778_v59 }
 0x19a   : > { %1168 = vtanh.f32 %v780_v47 }
 0x19b   : > { %1170 = vtanh.f32 %v781_v3 }
 0x19c   : > { %1172 = vlog2.f32 %v710_v38 }
 0x19d   : > { %1174 = vlog2.f32 %v711_v54 }
 0x1a4   : > { %v1169_v12 = vpop.eup %1168 }
 0x1a5   : > { %v1171_v15 = vpop.eup %1170  ;;  %v800_v4 = vmul.f32 %v1169_v12, %v786_v14  ;;  %v802_v20 = vmul.f32 %v1169_v12, %v790_v40  ;;  %v816_v57 = vmul.f32 %v1169_v12, %v1169_v12  ;;  %v804_v63 = vmul.f32 %v1169_v12, %v794_v22 }
 0x1a6   : > { %v801_v39 = vmul.f32 %v1171_v15, %v786_v14  ;;  %v803_v21 = vmul.f32 %v1171_v15, %v790_v40  ;;  %v817_v56 = vmul.f32 %v1171_v15, %v1171_v15  ;;  %v806_v29 = vmul.f32 %v1169_v12, %v798_v27  ;;  %v1173_v35 = vpop.eup %1172 }
 0x1a7   : > { %v808_v16 = vadd.f32 %v800_v4, %v1582_v18  ;;  %v810_v62 = vadd.f32 %v802_v20, %v1579_v17  ;;  %v818_v24 = vsub.f32 1.0, %v816_v57  ;;  %v805_v18 = vmul.f32 %v1171_v15, %v794_v22  ;;  %v1175_v41 = vpop.eup %1174 }
 0x1a8   : > { %v809_v61 = vadd.f32 %v801_v39, %v1592_v2  ;;  %v819_v25 = vsub.f32 1.0, %v817_v56  ;;  %v811_v26 = vadd.f32 %v803_v21, %v1589_v50  ;;  %v812_v28 = vadd.f32 %v804_v63, %v1585_v19 }
 0x1a9   : > { %852 = vxpose.xlu1.b32.start [1/4] (short) %v808_v16, 128  ;;  %v821_v60 = vmul.f32 %v820_v1, %v818_v24  ;;  %v813_v32 = vadd.f32 %v805_v18, %v1595_v0  ;;  %v807_v53 = vmul.f32 %v1171_v15, %v798_v27  ;;  %v814_v50 = vadd.f32 %v806_v29, %v1600_v55 }
 0x1aa   : > { %884 = vxpose.xlu0.b32.start [1/4] (short) %v809_v61, 128  ;;  %v822_v2 = vmul.f32 %v820_v1, %v819_v25  ;;  %v713_v19 = vmul.f32 0.6931472, %v1173_v35  ;;  %v715_v0 = vmul.f32 0.6931472, %v1175_v41 }
 0x1ab   : > { %v823_v30 = vadd.f32 1.0, %v821_v60  ;;  %v815_v42 = vadd.f32 %v807_v53, %v1605_v8 }
 0x1ac   : > { %v824_v31 = vadd.f32 1.0, %v822_v2  ;;  %v718_v43 = vcombine.low %v713_v19, %v715_v0 }
 0x1ad   : > { %853 = vxpose.xlu1.b32.cont [2/4] (short) %v810_v62, 128  ;;  %v825_v17 = vand.u32 2147483647, %v823_v30 }
 0x1ae   : > { %885 = vxpose.xlu0.b32.cont [2/4] (short) %v811_v26, 128  ;;  %v826_v34 = vand.u32 2147483647, %v824_v31  ;;  %v725_v46 = vrot.slane %v718_v43, %v1567_v51 }
 0x1af   : > { %v827_v36 = vadd.f32 1e-08, %v825_v17 }
 0x1b0   : > { %v828_v37 = vadd.f32 1e-08, %v826_v34  ;;  %v732_v5 = vrot.slane %v725_v46, %v1567_v51 }
 0x1b1   : > { %854 = vxpose.xlu1.b32.cont [3/4] (short) %v812_v28, 128  ;;  %1176 = vlog2.f32 %v827_v36 }
 0x1b2   : > { %886 = vxpose.xlu0.b32.cont [3/4] (short) %v813_v32, 128  ;;  %1178 = vlog2.f32 %v828_v37  ;;  %v734_v58 = vsub.f32 %v1608_v23, %v732_v5 }
 0x1b5   : > { %855 = vxpose.xlu1.b32.end [4/4] (short) %v814_v50, 128 }
 0x1b6   : > { %887 = vxpose.xlu0.b32.end [4/4] (short) %v815_v42, 128 }
 0x1bb   : > { %v1177_v44 = vpop.eup %1176 }
 0x1bc   : > { %v1179_v48 = vpop.eup %1178  ;;  %v830_v49 = vmul.f32 0.6931472, %v1177_v44 }
 0x1bd   : > { %v832_v55 = vmul.f32 0.6931472, %v1179_v48 }
 0x1bf   : > { %v835_v6 = vcombine.low %v830_v49, %v832_v55 }
 0x1c1   : > { %v842_v8 = vrot.slane %v835_v6, %v1567_v51 }
 0x1c3   : > { %v849_v7 = vrot.slane %v842_v8, %v1567_v51 }
 0x1c5   : > { %v851_v59 = vsub.f32 %v734_v58, %v849_v7 }
 0x1c7   : > { %953 = vst.msk [vmem:[%s252_s27] sm:$0x3] %vm951_vm0, %v851_v59 }
 0x1c8   : > { %1217 = shalt.err (!%p1214_p0)
}
 0x1c9   : > { %s1218_s29 = scalar_lea.hbm %s1632_s0, 32  ;;  %s1222_s25 = scalar_lea.hbm %s1745_s7, 64 }
 0x1ca   : > { %p1219_p3 = scmp.ne.s32.totalorder %s1632_s0, %s1218_s29  ;;  %p1223_p6 = scmp.lt.u32.totalorder %s1632_s0, %s1745_s7 }
 0x1cb   : > { %p1224_p7 = scmp.lt.u32.totalorder %s1222_s25, %s1218_s29  ;;  %p1226_p9 = scmp.lt.u32.totalorder %s1218_s29, %s1632_s0 }
 0x1cc   : > { %p1220_p4 = pnand %p1219_p3, %p1362_p1 }
 0x1cd   : > { %p1225_p8 = por %p1224_p7, %p1223_p6 }
 0x1ce   : > { %p1221_p5 = pneg %p1220_p4 }
 0x1cf   : > { %p1227_p10 = por %p1226_p9, %p1225_p8 }
 0x1d1   : > { %p1228_p11 = pnand %p1227_p10, %p1221_p5 }
 0x1d3   : > { %1231 = shalt.err (!%p1228_p11)
}
 0x1d4   : > { %1093 = dma.vmem_to_hbm [thread:$0]  (%p1362_p1), %s979_s14, 32, %s1632_s0, %s960_s16   ;;  %vm916_vm1 = vcmask 261120  }
 0x1d5   : > { %s1656_s13 = scalar_lea.vmem %s1744_s6, %s1077_s8 }
 0x229   : > { %v868_v33 = vpop.trf.xlu1 }
 0x22a   : > { %v900_v51 = vpop.trf.xlu0  ;;  %917 = vst.msk [vmem:[%s1656_s13] sm:$0xff] %vm916_vm1, %v868_v33 }
 0x22b   : > { %933 = vst.msk [vmem:[%s1656_s13 + $0x80] sm:$0xff] %vm916_vm1, %v900_v51 }
 0x22d   : > { %v869_v23 = vpop.trf.xlu1 }
 0x22e   : > { %v901_v47 = vpop.trf.xlu0  ;;  %918 = vst.msk [vmem:[%s1656_s13 + $0x8] sm:$0xff] %vm916_vm1, %v869_v23 }
 0x22f   : > { %934 = vst.msk [vmem:[%s1656_s13 + $0x88] sm:$0xff] %vm916_vm1, %v901_v47 }
 0x231   : > { %v870_v3 = vpop.trf.xlu1 }
 0x232   : > { %v902_v9 = vpop.trf.xlu0  ;;  %919 = vst.msk [vmem:[%s1656_s13 + $0x10] sm:$0xff] %vm916_vm1, %v870_v3 }
 0x233   : > { %935 = vst.msk [vmem:[%s1656_s13 + $0x90] sm:$0xff] %vm916_vm1, %v902_v9 }
 0x235   : > { %v871_v52 = vpop.trf.xlu1 }
 0x236   : > { %v903_v11 = vpop.trf.xlu0  ;;  %920 = vst.msk [vmem:[%s1656_s13 + $0x18] sm:$0xff] %vm916_vm1, %v871_v52 }
 0x237   : > { %936 = vst.msk [vmem:[%s1656_s13 + $0x98] sm:$0xff] %vm916_vm1, %v903_v11 }
 0x239   : > { %v872_v13 = vpop.trf.xlu1 }
 0x23a   : > { %v904_v10 = vpop.trf.xlu0  ;;  %921 = vst.msk [vmem:[%s1656_s13 + $0x20] sm:$0xff] %vm916_vm1, %v872_v13 }
 0x23b   : > { %937 = vst.msk [vmem:[%s1656_s13 + $0xa0] sm:$0xff] %vm916_vm1, %v904_v10 }
 0x23d   : > { %v873_v45 = vpop.trf.xlu1 }
 0x23e   : > { %v905_v12 = vpop.trf.xlu0  ;;  %922 = vst.msk [vmem:[%s1656_s13 + $0x28] sm:$0xff] %vm916_vm1, %v873_v45 }
 0x23f   : > { %938 = vst.msk [vmem:[%s1656_s13 + $0xa8] sm:$0xff] %vm916_vm1, %v905_v12 }
 0x241   : > { %v874_v14 = vpop.trf.xlu1 }
 0x242   : > { %v906_v15 = vpop.trf.xlu0  ;;  %923 = vst.msk [vmem:[%s1656_s13 + $0x30] sm:$0xff] %vm916_vm1, %v874_v14 }
 0x243   : > { %939 = vst.msk [vmem:[%s1656_s13 + $0xb0] sm:$0xff] %vm916_vm1, %v906_v15 }
 0x245   : > { %v875_v4 = vpop.trf.xlu1 }
 0x246   : > { %v907_v38 = vpop.trf.xlu0  ;;  %924 = vst.msk [vmem:[%s1656_s13 + $0x38] sm:$0xff] %vm916_vm1, %v875_v4 }
 0x247   : > { %940 = vst.msk [vmem:[%s1656_s13 + $0xb8] sm:$0xff] %vm916_vm1, %v907_v38 }
 0x249   : > { %v876_v39 = vpop.trf.xlu1 }
 0x24a   : > { %v908_v40 = vpop.trf.xlu0  ;;  %925 = vst.msk [vmem:[%s1656_s13 + $0x40] sm:$0xff] %vm916_vm1, %v876_v39 }
 0x24b   : > { %941 = vst.msk [vmem:[%s1656_s13 + $0xc0] sm:$0xff] %vm916_vm1, %v908_v40 }
 0x24d   : > { %v877_v54 = vpop.trf.xlu1 }
 0x24e   : > { %v909_v16 = vpop.trf.xlu0  ;;  %926 = vst.msk [vmem:[%s1656_s13 + $0x48] sm:$0xff] %vm916_vm1, %v877_v54 }
 0x24f   : > { %942 = vst.msk [vmem:[%s1656_s13 + $0xc8] sm:$0xff] %vm916_vm1, %v909_v16 }
 0x251   : > { %v878_v20 = vpop.trf.xlu1 }
 0x252   : > { %v910_v61 = vpop.trf.xlu0  ;;  %927 = vst.msk [vmem:[%s1656_s13 + $0x50] sm:$0xff] %vm916_vm1, %v878_v20 }
 0x253   : > { %943 = vst.msk [vmem:[%s1656_s13 + $0xd0] sm:$0xff] %vm916_vm1, %v910_v61 }
 0x255   : > { %v879_v21 = vpop.trf.xlu1 }
 0x256   : > { %v911_v57 = vpop.trf.xlu0  ;;  %928 = vst.msk [vmem:[%s1656_s13 + $0x58] sm:$0xff] %vm916_vm1, %v879_v21 }
 0x257   : > { %944 = vst.msk [vmem:[%s1656_s13 + $0xd8] sm:$0xff] %vm916_vm1, %v911_v57 }
 0x259   : > { %v880_v56 = vpop.trf.xlu1 }
 0x25a   : > { %v912_v22 = vpop.trf.xlu0  ;;  %929 = vst.msk [vmem:[%s1656_s13 + $0x60] sm:$0xff] %vm916_vm1, %v880_v56 }
 0x25b   : > { %945 = vst.msk [vmem:[%s1656_s13 + $0xe0] sm:$0xff] %vm916_vm1, %v912_v22 }
 0x25d   : > { %v881_v1 = vpop.trf.xlu1 }
 0x25e   : > { %v913_v62 = vpop.trf.xlu0  ;;  %930 = vst.msk [vmem:[%s1656_s13 + $0x68] sm:$0xff] %vm916_vm1, %v881_v1 }
 0x25f   : > { %946 = vst.msk [vmem:[%s1656_s13 + $0xe8] sm:$0xff] %vm916_vm1, %v913_v62 }
 0x261   : > { %v882_v63 = vpop.trf.xlu1 }
 0x262   : > { %v914_v24 = vpop.trf.xlu0  ;;  %931 = vst.msk [vmem:[%s1656_s13 + $0x70] sm:$0xff] %vm916_vm1, %v882_v63 }
 0x263   : > { %947 = vst.msk [vmem:[%s1656_s13 + $0xf0] sm:$0xff] %vm916_vm1, %v914_v24 }
 0x265   : > { %v883_v25 = vpop.trf.xlu1 }
 0x266   : > { %v915_v26 = vpop.trf.xlu0  ;;  %932 = vst.msk [vmem:[%s1656_s13 + $0x78] sm:$0xff] %vm916_vm1, %v883_v25 }
 0x267   : > { %948 = vst.msk [vmem:[%s1656_s13 + $0xf8] sm:$0xff] %vm916_vm1, %v915_v26 }
 0x268 PF: > { %p1099_p1 = scmp.ge.s32.totalorder %s1268_s12, 2  ;;  %s998_s19 = sand.u32 1, %s1256_s1  }
 0x269   : > { %s999_s30 = scalar_lea.sflag [#allocation6], %s998_s19 }
 0x26a   : > { %p1096_p12 = pnand %p1099_p1, %p1366_p2 }
 0x26c   : > { %1251 = dma.done.wait (!%p1096_p12), %s999_s30, 32  }
 0x26d   : > { %1253 = vsyncadd (!%p1096_p12), %s999_s30, 4294967264  ;;  %p28_p13 = scmp.ge.s32.totalorder %s1349_s15, 4   ;;  %s1749_s1 = smov %s1260_s10 }
 0x26e   : > { %s1750_s10 = smov %s1264_s11  ;;  %s1751_s11 = smov %s1360_s18 }
 0x26f   : > { %s1752_s12 = smov %s1349_s15  ;;  %30 = sbr.rel (!%p28_p13) target bundleno = 28 (0x1c), region = 86 }
 0x276   :  { %1004 = vsyncpa [#allocation6], 1 }
 0x277   :  { %1006 = vsyncpa [#allocation6 + $0x1], 1 }

// kernel: tpu_custom_call.1
= control target key start
LH: loop header
LB: loop body
LE: loop exit
PB: predicated region body
PF: predicated region fallthrough
CT: control target
= control target key end

     0   :  { %s1668_s0 = inlined_call_operand.vmem [shape: f32[4], index: 0, kind: input, shape index: {}]   ;;  %s1669_s2 = inlined_call_operand.hbm [shape: f32[32,512], index: 2, kind: input, shape index: {}]   ;;  %s1670_s3 = inlined_call_operand.vmem [shape: f32[1,512], index: 3, kind: input, shape index: {}]   ;;  %s1671_s4 = inlined_call_operand.vmem [shape: f32[32,4], index: 4, kind: input, shape index: {}]   ;;  %s1672_s5 = inlined_call_operand.vmem [shape: f32[32,4], index: 5, kind: input, shape index: {}]   ;;  %s1673_s6 = inlined_call_operand.hbm [shape: f32[32,512], index: 6, kind: output, shape index: {0}]   ;;  %s1674_s7 = inlined_call_operand.hbm [shape: f32[1,512], index: 7, kind: output, shape index: {1}]   ;;  %s1675_s1 = inlined_call_operand.vmem [shape: f32[4], index: 1, kind: input, shape index: {}]  }
   0x1   :  { %s13_s26 = sshll.u32 %s1668_s0, 4  ;;  %s17_s29 = sshll.u32 %s1675_s1, 4  ;;  %s14_s26 = int_to_ptr.vmem [resolvable:$true] %s13_s26  ;;  %s18_s29 = int_to_ptr.vmem [resolvable:$true] %s17_s29 }
   0x2   :  { %s1073_s30 = scalar_lea.vmem %s14_s26, 16  ;;  %p1078_p1 = scmp.lt.s32.totalorder %s14_s26, %s14_s26 }
   0x3   :  { %p1074_p0 = scmp.ne.s32.totalorder %s14_s26, %s1073_s30  ;;  %p1079_p2 = scmp.lt.s32.totalorder %s1073_s30, %s1073_s30 }
   0x5   :  { %p1080_p3 = por %p1079_p2, %p1078_p1 }
   0x7   :  { %p1081_p4 = pnand %p1080_p3, %p1074_p0 }
   0x9   :  { %1084 = shalt.err (!%p1081_p4)  }
   0xa   :  { %s1229_s8 = smov [#allocation3]   ;;  %s1085_s9 = scalar_lea.vmem %s18_s29, 16 }
   0xb   :  { %16 = dma.vmem_to_smem %s14_s26, 16, %s1229_s8, [#allocation2] }
   0xc   :  { %p1086_p5 = scmp.ne.s32.totalorder %s18_s29, %s1085_s9  ;;  %p1090_p6 = scmp.lt.s32.totalorder %s18_s29, %s18_s29 }
   0xd   :  { %p1091_p7 = scmp.lt.s32.totalorder %s1085_s9, %s1085_s9 }
   0xf   :  { %p1092_p8 = por %p1091_p7, %p1090_p6 }
  0x11   :  { %p1093_p9 = pnand %p1092_p8, %p1086_p5 }
  0x13   :  { %1096 = shalt.err (!%p1093_p9)  }
  0x14   :  { %s1230_s0 = smov [#allocation4]  }
  0x15   :  { %20 = dma.vmem_to_smem %s18_s29, 16, %s1230_s0, [#allocation2] }
  0x16   :  { %1199 = dma.done.wait [#allocation2], 32 }
  0x17   :  { %1200 = vsyncadd [#allocation2], 4294967264 }
  0x18   :  { %22 = sfence }
  0x19   :  { %23 = vsyncpa [#allocation6], 0 }
  0x1a   :  { %25 = vsyncpa [#allocation6 + $0x1], 0 }
  0x1b   :  { %26 = vsyncpa [#allocation7], 0 }
  0x1c   :  { %28 = vsyncpa [#allocation7 + $0x1], 0 }
  0x1d   :  { %29 = vsyncpa [#allocation10], 0 }
  0x1e   :  { %31 = vsyncpa [#allocation10 + $0x1], 0  ;;  %s1291_s1 = smov 0   ;;  %s1293_s10 = smov 0  }
  0x1f   :  { %s1295_s11 = smov 0   ;;  %s1297_s12 = smov 0  }
  0x20 LB: > { %s1312_s13 = sadd.s32 4294967295, %s1227_s12   ;;  %s941_s14 = sadd.s32 4294967294, %s1227_s12   ;;  %s1227_s12 = sphi %s1297_s12, %s1689_s12   ;;  %s1223_s11 = sphi %s1295_s11, %s1688_s11   ;;  %s1219_s10 = sphi %s1293_s10, %s1687_s10   ;;  %s1215_s1 = sphi %s1291_s1, %s1686_s1  }
  0x21   : > { %s1316_s15 = sadd.s32 1, %s1227_s12   ;;  %s44_s16 = sadd.s32 1, %s1223_s11 }
  0x22   : > { %s41_s17 = ssub.s32 %s1227_s12, %s1316_s15  ;;  %p51_p10 = scmp.ne.s32.totalorder %s1223_s11, %s1219_s10 }
  0x23   : > { %p42_p11 = scmp.eq.s32.totalorder %s41_s17, 0  ;;  %p52_p12 = scmp.eq.s32.totalorder %s1227_s12, 0 }
  0x24   : > { %p57_p13 = scmp.ne.s32.totalorder %s1219_s10, %s1215_s1  ;;  %p58_p0 = scmp.eq.s32.totalorder %s1312_s13, 0 }
  0x25   : > { %s1328_s18 = scalar_select %p42_p11, %s1223_s11, %s44_s16  }
  0x26   : > { %p1330_p1 = por %p52_p12, %p51_p10  ;;  %p1334_p2 = por %p58_p0, %p57_p13 }
  0x27   : > { %p149_p3 = scmp.eq.s32.totalorder %s1312_s13, 1  ;;  %p155_p4 = scmp.eq.s32.totalorder %s941_s14, 1 }
  0x28   : > { %p986_p6 = scmp.lt.s32.totalorder %s1227_s12, 2  ;;  %s207_s23 = sand.u32 1, %s1223_s11  }
  0x29   : > { %p1341_p7 = por %p149_p3, %p51_p10  ;;  %p1345_p8 = por %p155_p4, %p57_p13 }
  0x2a   : > { %s966_s24 = sshll.u32 %s1227_s12, 8  ;;  %s944_s25 = sshll.u32 %s207_s23, 6 }
  0x2b   : > { %s1679_s21 = scalar_select %p1341_p7, 1, 0 }
  0x2c   : > { %s1680_s22 = scalar_select %p1345_p8, 1, 0 }
  0x2d   : > { %s1354_s28 = scalar_lea.hbm %s1669_s2, %s966_s24  ;;  %s211_s29 = scalar_lea.vmem [#allocation5], %s944_s25 }
  0x2e   : > { %s218_s30 = sshll.u32 %s211_s29, 4  ;;  %p1358_p9 = pnand %p986_p6, %p1330_p1  ;;  %s1362_s30 = int_to_ptr.vmem [resolvable:$true] %s218_s30 }
  0x2f   : > { %s1365_s9 = scalar_lea.sflag [#allocation6], %s207_s23  ;;  %s1097_s0 = scalar_lea.hbm %s1354_s28, 1024 }
  0x30   : > { %p1098_p11 = scmp.ne.s32.totalorder %s1354_s28, %s1097_s0  ;;  %p1099_p12 = pneg %p1358_p9 }
  0x31   : > { %s1102_s17 = scalar_lea.hbm %s1669_s2, 2048  ;;  %p1103_p1 = scmp.lt.u32.totalorder %s1354_s28, %s1669_s2 }
  0x32   : > { %p1100_p13 = pnand %p1099_p12, %p1098_p11  ;;  %p1104_p3 = scmp.lt.u32.totalorder %s1102_s17, %s1097_s0 }
  0x33   : > { %p1106_p6 = scmp.lt.u32.totalorder %s1097_s0, %s1354_s28 }
  0x34   : > { %p1101_p0 = pneg %p1100_p13  ;;  %p1105_p4 = por %p1104_p3, %p1103_p1 }
  0x36   : > { %p1107_p5 = por %p1106_p6, %p1105_p4 }
  0x38   : > { %p1108_p10 = pnand %p1107_p5, %p1101_p0 }
  0x3a   : > { %1111 = shalt.err (!%p1108_p10)
}
  0x3b   : > { %s1112_s23 = scalar_lea.vmem %s1362_s30, 1024  ;;  %s1231_s25 = smov [#allocation5]  }
  0x3c   : > { %p1113_p11 = scmp.ne.s32.totalorder %s1362_s30, %s1112_s23  ;;  %s1117_s26 = sshll.u32 %s1231_s25, 4  ;;  %s1118_s26 = int_to_ptr.vmem [resolvable:$false] %s1117_s26 }
  0x3d   : > { %s1119_s27 = scalar_lea.vmem %s1118_s26, 2048  ;;  %p1120_p7 = scmp.lt.s32.totalorder %s1362_s30, %s1118_s26 }
  0x3e   : > { %p1115_p13 = pnand %p1113_p11, %p1099_p12  ;;  %p1121_p1 = scmp.lt.s32.totalorder %s1119_s27, %s1112_s23 }
  0x40   : > { %p1116_p8 = pneg %p1115_p13  ;;  %p1122_p3 = por %p1121_p1, %p1120_p7 }
  0x42   : > { %p1123_p4 = pnand %p1122_p3, %p1116_p8 }
  0x44   : > { %1126 = shalt.err (!%p1123_p4)
}
  0x45   : > { %s1232_s29 = smov 512   ;;  %s1233_s0 = smov 256  }
  0x46   : > { %s1234_s14 = smov 16   ;;  %p234_p5 = scmp.lt.s32.totalorder %s1227_s12, 3 }
  0x47   : > { %978 = dma.hbm_to_vmem [thread:$0]  (!%p1358_p9), %s1354_s28, 1024, %s1362_s30, %s1365_s9, %s1232_s29, %s1233_s0, %s1234_s14  }
  0x48   : > { %p1682_p10 = scmp.ge.s32.totalorder %s1227_s12, 1 }
  0x4a   : > { %p235_p12 = pnand %p1682_p10, %p234_p5 }
  0x4b   : > { %s1397_s16 = sand.u32 (!%p235_p12), 1, %s1219_s10  }
  0x4c   : > { %238 = sbr.rel (%p235_p12) target bundleno = 428 (0x1ac), region = 36  ;;  %s948_s17 = sshll.u32 (!%p235_p12), %s1397_s16, 6 }
  0x4d   : > { %s241_s19 = scalar_lea.sflag (!%p235_p12), [#allocation6], %s1397_s16  ;;  %s1403_s24 = scalar_lea.vmem (!%p235_p12), [#allocation5], %s948_s17 }
  0x53   : > { %1202 = dma.done.wait (%p1334_p2), %s241_s19, 1024  }
  0x54   : > { %1204 = vsyncadd (%p1334_p2), %s241_s19, 4294966272  ;;  %v1235_v0 = vmov 0   ;;  %v303_v1 = vld [vmem:[%s1672_s5 + $0x10] sm:$0xff]  ;;  %v301_v2 = vld [vmem:[%s1672_s5] sm:$0xff]  ;;  %v1236_v9 = vmov 1   ;;  %v1237_v10 = vmov 2  }
  0x55   : > { %1034 = vset.pattern.permute.xlu1 %v1235_v0  ;;  %1033 = vset.pattern.permute.xlu0 %v1235_v0  ;;  %v304_v3 = vld [vmem:[%s1672_s5 + $0x18] sm:$0xff]  ;;  %v302_v4 = vld [vmem:[%s1672_s5 + $0x8] sm:$0xff]  ;;  %v297_v6 = vld [vmem:[%s1671_s4] sm:$0xff]  ;;  %v1238_v11 = vmov 3   ;;  %s305_s9 = sld [smem:[#allocation3]]  ;;  %s952_s23 = sld [smem:[#allocation3 + $0x1]] }
  0x56   : > { %319 = vperm.xlu1 %1034, %v303_v1   ;;  %309 = vperm.xlu0 %1033, %v301_v2   ;;  %v298_v5 = vld [vmem:[%s1671_s4 + $0x8] sm:$0xff]  ;;  %v300_v7 = vld [vmem:[%s1671_s4 + $0x18] sm:$0xff]  ;;  %v299_v8 = vld [vmem:[%s1671_s4 + $0x10] sm:$0xff]  ;;  %s1474_s25 = sld [smem:[#allocation4 + $0x1]]  ;;  %s954_s26 = sld [smem:[#allocation3 + $0x2]] }
  0x57   : > { %v288_v14 = vld [vmem:[%s1403_s24] sm:$0xff]  ;;  %v289_v15 = vld [vmem:[%s1403_s24 + $0x8] sm:$0xff]  ;;  %v290_v16 = vld [vmem:[%s1403_s24 + $0x10] sm:$0xff]  ;;  %s951_s20 = sshll.u32 %s1312_s13, 1  ;;  %s956_s14 = sld [smem:[#allocation3 + $0x3]] }
  0x58   : > { %v291_v17 = vld [vmem:[%s1403_s24 + $0x18] sm:$0xff]  ;;  %v292_v18 = vld [vmem:[%s1403_s24 + $0x20] sm:$0xff]  ;;  %v293_v19 = vld [vmem:[%s1403_s24 + $0x28] sm:$0xff]  ;;  %p282_p2 = scmp.lt.s32.totalorder %s951_s20, 3  ;;  %s955_s19 = sld [smem:[#allocation4 + $0x2]] }
  0x59   : > { %v294_v26 = vld [vmem:[%s1403_s24 + $0x30] sm:$0xff]  ;;  %v295_v27 = vld [vmem:[%s1403_s24 + $0x38] sm:$0xff]  ;;  %s1441_s24 = sld [smem:[#allocation4]]  ;;  %s1557_s28 = sld [smem:[#allocation4 + $0x3]] }
  0x5a   : > { %324 = vperm.xlu1 %1034, %v304_v3   ;;  %314 = vperm.xlu0 %1033, %v302_v4   ;;  %s1691_s20 = smov (!%p282_p2, %s951_s20), 3  ;;  %s1561_s30 = scalar_lea.vmem [#allocation8], %s948_s17 }
  0x5b   : > { %v353_v48 = vstv %s305_s9  ;;  %s284_s0 = scalar_lea.vmem %s1670_s3, %s1691_s20  ;;  %s813_s8 = sshll.u32 %s1561_s30, 4  ;;  %s1565_s8 = int_to_ptr.vmem [resolvable:$true] %s813_s8 }
  0x5c   : > { %s967_s9 = sshll.u32 %s1312_s13, 8  ;;  %p1683_p8 = scmp.ne.s32.totalorder %s1679_s21, 0 }
  0x5d   : > { %s1240_s20 = smov [#allocation8]  }
  0x5e   : > { %365 = vperm.xlu1 %1034, %v298_v5   ;;  %360 = vperm.xlu0 %1033, %v297_v6   ;;  %s1131_s27 = sshll.u32 %s1240_s20, 4  ;;  %s1132_s27 = int_to_ptr.vmem [resolvable:$false] %s1131_s27 }
  0x5f   : > { %s1133_s29 = scalar_lea.vmem %s1132_s27, 2048  ;;  %p1134_p6 = scmp.lt.s32.totalorder %s1565_s8, %s1132_s27 }
  0x62   : > { %375 = vperm.xlu1 %1034, %v300_v7   ;;  %370 = vperm.xlu0 %1033, %v299_v8  }
  0x66   : > { %1036 = vset.pattern.permute.xlu1 %v1236_v9  ;;  %1035 = vset.pattern.permute.xlu0 %v1236_v9 }
  0x67   : > { %437 = vperm.xlu1 %1036, %v302_v4   ;;  %433 = vperm.xlu0 %1035, %v301_v2  }
  0x6b   : > { %441 = vperm.xlu1 %1036, %v303_v1   ;;  %445 = vperm.xlu0 %1035, %v304_v3  }
  0x6f   : > { %480 = vperm.xlu1 %1036, %v297_v6   ;;  %484 = vperm.xlu0 %1035, %v298_v5  }
  0x73   : > { %488 = vperm.xlu1 %1036, %v299_v8   ;;  %492 = vperm.xlu0 %1035, %v300_v7  }
  0x77   : > { %1037 = vset.pattern.permute.xlu1 %v1237_v10  ;;  %1038 = vset.pattern.permute.xlu0 %v1237_v10 }
  0x78   : > { %550 = vperm.xlu1 %1037, %v301_v2   ;;  %554 = vperm.xlu0 %1038, %v302_v4  }
  0x7c   : > { %558 = vperm.xlu1 %1037, %v303_v1   ;;  %597 = vperm.xlu0 %1038, %v297_v6  }
  0x80   : > { %562 = vperm.xlu1 %1037, %v304_v3   ;;  %605 = vperm.xlu0 %1038, %v299_v8  }
  0x84   : > { %601 = vperm.xlu1 %1037, %v298_v5   ;;  %1039 = vset.pattern.permute.xlu0 %v1238_v11 }
  0x85   : > { %667 = vperm.xlu0 %1039, %v301_v2  }
  0x88   : > { %609 = vperm.xlu1 %1037, %v300_v7  }
  0x89   : > { %679 = vperm.xlu0 %1039, %v304_v3  }
  0x8c   : > { %1040 = vset.pattern.permute.xlu1 %v1238_v11 }
  0x8d   : > { %671 = vperm.xlu1 %1040, %v302_v4   ;;  %718 = vperm.xlu0 %1039, %v298_v5  }
  0x91   : > { %675 = vperm.xlu1 %1040, %v303_v1   ;;  %726 = vperm.xlu0 %1039, %v300_v7  }
  0x95   : > { %714 = vperm.xlu1 %1040, %v297_v6  }
  0x99   : > { %722 = vperm.xlu1 %1040, %v299_v8  }
  0xd5   : > { %v320_v12 = vpop.permute.xlu1 %319  ;;  %v310_v13 = vpop.permute.xlu0 %309 }
  0xd6   : > { %v327_v21 = vmul.f32 %v310_v13, %v288_v14  ;;  %v328_v22 = vmul.f32 %v310_v13, %v289_v15  ;;  %v331_v28 = vmul.f32 %v320_v12, %v292_v18  ;;  %v332_v29 = vmul.f32 %v320_v12, %v293_v19 }
  0xd9   : > { %v315_v20 = vpop.permute.xlu0 %314  ;;  %v325_v25 = vpop.permute.xlu1 %324 }
  0xda   : > { %v329_v23 = vmul.f32 %v315_v20, %v290_v16  ;;  %v330_v24 = vmul.f32 %v315_v20, %v291_v17  ;;  %v333_v32 = vmul.f32 %v325_v25, %v294_v26  ;;  %v334_v33 = vmul.f32 %v325_v25, %v295_v27 }
  0xdb   : > { %v398_v25 = vstv %s1441_s24 }
  0xdc   : > { %v335_v30 = vadd.f32 %v329_v23, %v327_v21  ;;  %v344_v31 = vadd.f32 %v330_v24, %v328_v22 }
  0xdd   : > { %v366_v53 = vpop.permute.xlu1 %365  ;;  %v361_v54 = vpop.permute.xlu0 %360 }
  0xde   : > { %v336_v34 = vadd.f32 %v335_v30, %v331_v28  ;;  %v345_v35 = vadd.f32 %v344_v31, %v332_v29 }
  0xe0   : > { %v337_v36 = vadd.f32 %v336_v34, %v333_v32  ;;  %v346_v37 = vadd.f32 %v345_v35, %v334_v33 }
  0xe1   : > { %v376_v55 = vpop.permute.xlu1 %375  ;;  %v371_v56 = vpop.permute.xlu0 %370 }
  0xe2   : > { %v338_v38 = vrot.slane %v337_v36, 4  ;;  %v347_v39 = vrot.slane %v346_v37, 4 }
  0xe4   : > { %v339_v40 = vadd.f32 %v338_v38, %v337_v36  ;;  %v348_v41 = vadd.f32 %v347_v39, %v346_v37 }
  0xe6   : > { %v340_v42 = vrot.slane %v339_v40, 2  ;;  %v349_v43 = vrot.slane %v348_v41, 2  ;;  %v438_v58 = vpop.permute.xlu1 %437  ;;  %v434_v4 = vpop.permute.xlu0 %433 }
  0xe8   : > { %v341_v44 = vadd.f32 %v340_v42, %v339_v40  ;;  %v350_v45 = vadd.f32 %v349_v43, %v348_v41 }
  0xea   : > { %v342_v46 = vrot.slane %v341_v44, 1  ;;  %v351_v47 = vrot.slane %v350_v45, 1  ;;  %v442_v20 = vpop.permute.xlu1 %441  ;;  %v446_v24 = vpop.permute.xlu0 %445 }
  0xec   : > { %v343_v49 = vadd.f32 %v342_v46, %v341_v44  ;;  %v352_v50 = vadd.f32 %v351_v47, %v350_v45 }
  0xee   : > { %v354_v51 = vadd.f32 %v353_v48, %v343_v49  ;;  %v355_v52 = vadd.f32 %v353_v48, %v352_v50 }
  0xf0   : > { %1041 = vtanh.f32 %v354_v51  ;;  %v474_v51 = vstv %s952_s23  ;;  %s1574_s23 = scalar_lea.hbm %s1673_s6, %s967_s9 }
  0xf1   : > { %1043 = vtanh.f32 %v355_v52 }
  0xfa   : > { %v1042_v57 = vpop.eup %1041 }
  0xfb   : > { %v1044_v59 = vpop.eup %1043  ;;  %v380_v60 = vmul.f32 %v1042_v57, %v366_v53  ;;  %v378_v61 = vmul.f32 %v1042_v57, %v361_v54  ;;  %v384_v62 = vmul.f32 %v1042_v57, %v376_v55  ;;  %v382_v63 = vmul.f32 %v1042_v57, %v371_v56 }
  0xfc   : > { %v381_v0 = vmul.f32 %v1044_v59, %v366_v53  ;;  %v379_v1 = vmul.f32 %v1044_v59, %v361_v54  ;;  %v385_v2 = vmul.f32 %v1044_v59, %v376_v55  ;;  %v383_v3 = vmul.f32 %v1044_v59, %v371_v56  ;;  %v481_v54 = vpop.permute.xlu1 %480 }
  0xfd   : > { %v1443_v5 = vadd.f32 %v380_v60, %v290_v16  ;;  %v1445_v6 = vadd.f32 %v378_v61, %v288_v14  ;;  %v1447_v7 = vadd.f32 %v382_v63, %v292_v18  ;;  %v1457_v13 = vadd.f32 %v384_v62, %v294_v26  ;;  %v485_v62 = vpop.permute.xlu0 %484 }
  0xfe   : > { %v1449_v8 = vadd.f32 %v381_v0, %v291_v17  ;;  %v1451_v9 = vadd.f32 %v379_v1, %v289_v15  ;;  %v1453_v10 = vadd.f32 %v383_v3, %v293_v19  ;;  %v1461_v18 = vadd.f32 %v385_v2, %v295_v27 }
  0xff   : > { %v450_v11 = vmul.f32 %v438_v58, %v1443_v5  ;;  %v448_v12 = vmul.f32 %v434_v4, %v1445_v6  ;;  %v452_v15 = vmul.f32 %v442_v20, %v1447_v7  ;;  %v394_v21 = vmul.f32 %v1042_v57, %v1042_v57 }
 0x100   : > { %v451_v16 = vmul.f32 %v438_v58, %v1449_v8  ;;  %v449_v14 = vmul.f32 %v434_v4, %v1451_v9  ;;  %v395_v22 = vmul.f32 %v1044_v59, %v1044_v59  ;;  %v453_v23 = vmul.f32 %v442_v20, %v1453_v10  ;;  %v489_v59 = vpop.permute.xlu1 %488 }
 0x101   : > { %v456_v17 = vadd.f32 %v450_v11, %v448_v12  ;;  %v454_v26 = vmul.f32 %v446_v24, %v1457_v13  ;;  %v396_v29 = vsub.f32 1.0, %v394_v21  ;;  %v455_v32 = vmul.f32 %v446_v24, %v1461_v18  ;;  %v493_v3 = vpop.permute.xlu0 %492 }
 0x102   : > { %v465_v19 = vadd.f32 %v451_v16, %v449_v14  ;;  %v397_v30 = vsub.f32 1.0, %v395_v22 }
 0x103   : > { %v457_v28 = vadd.f32 %v456_v17, %v452_v15  ;;  %v399_v33 = vmul.f32 %v398_v25, %v396_v29 }
 0x104   : > { %v466_v31 = vadd.f32 %v465_v19, %v453_v23  ;;  %v400_v34 = vmul.f32 %v398_v25, %v397_v30  ;;  %v551_v0 = vpop.permute.xlu1 %550 }
 0x105   : > { %v458_v27 = vadd.f32 %v457_v28, %v454_v26  ;;  %v401_v37 = vadd.f32 1.0, %v399_v33  ;;  %v555_v26 = vpop.permute.xlu0 %554 }
 0x106   : > { %v467_v35 = vadd.f32 %v466_v31, %v455_v32  ;;  %v402_v38 = vadd.f32 1.0, %v400_v34 }
 0x107   : > { %v459_v36 = vrot.slane %v458_v27, 4  ;;  %v403_v41 = vand.u32 2147483647, %v401_v37 }
 0x108   : > { %v468_v39 = vrot.slane %v467_v35, 4  ;;  %v404_v42 = vand.u32 2147483647, %v402_v38  ;;  %v559_v22 = vpop.permute.xlu1 %558 }
 0x109   : > { %v460_v40 = vadd.f32 %v459_v36, %v458_v27  ;;  %v405_v45 = vadd.f32 1e-08, %v403_v41 }
 0x10a   : > { %v469_v43 = vadd.f32 %v468_v39, %v467_v35  ;;  %v406_v46 = vadd.f32 1e-08, %v404_v42 }
 0x10b   : > { %v461_v44 = vrot.slane %v460_v40, 2  ;;  %1045 = vlog2.f32 %v405_v45 }
 0x10c   : > { %v470_v47 = vrot.slane %v469_v43, 2  ;;  %1047 = vlog2.f32 %v406_v46  ;;  %v563_v34 = vpop.permute.xlu1 %562 }
 0x10d   : > { %v462_v48 = vadd.f32 %v461_v44, %v460_v40 }
 0x10e   : > { %v471_v49 = vadd.f32 %v470_v47, %v469_v43 }
 0x10f   : > { %v463_v50 = vrot.slane %v462_v48, 1 }
 0x110   : > { %v472_v52 = vrot.slane %v471_v49, 1 }
 0x111   : > { %v464_v53 = vadd.f32 %v463_v50, %v462_v48 }
 0x112   : > { %v473_v55 = vadd.f32 %v472_v52, %v471_v49 }
 0x113   : > { %v475_v56 = vadd.f32 %v474_v51, %v464_v53 }
 0x114   : > { %v476_v57 = vadd.f32 %v474_v51, %v473_v55 }
 0x115   : > { %1049 = vtanh.f32 %v475_v56  ;;  %v1046_v58 = vpop.eup %1045 }
 0x116   : > { %1051 = vtanh.f32 %v476_v57  ;;  %v1048_v60 = vpop.eup %1047  ;;  %v1468_v61 = vmul.f32 0.6931472, %v1046_v58 }
 0x117   : > { %v1470_v63 = vmul.f32 0.6931472, %v1048_v60  ;;  %v1239_v60 = vmov 1966171168  }
 0x119   : > { %v413_v1 = vcombine.low %v1468_v61, %v1470_v63 }
 0x11f   : > { %v1050_v2 = vpop.eup %1049 }
 0x120   : > { %v1052_v4 = vpop.eup %1051  ;;  %v495_v11 = vmul.f32 %v1050_v2, %v481_v54  ;;  %v497_v12 = vmul.f32 %v1050_v2, %v485_v62  ;;  %v499_v16 = vmul.f32 %v1050_v2, %v489_v59  ;;  %v501_v14 = vmul.f32 %v1050_v2, %v493_v3 }
 0x121   : > { %v496_v20 = vmul.f32 %v1052_v4, %v481_v54  ;;  %v498_v17 = vmul.f32 %v1052_v4, %v485_v62  ;;  %v500_v15 = vmul.f32 %v1052_v4, %v489_v59  ;;  %v502_v21 = vmul.f32 %v1052_v4, %v493_v3 }
 0x122   : > { %v1477_v19 = vadd.f32 %v495_v11, %v1445_v6  ;;  %v1480_v23 = vadd.f32 %v499_v16, %v1447_v7  ;;  %v1483_v24 = vadd.f32 %v497_v12, %v1443_v5  ;;  %v1496_v30 = vadd.f32 %v501_v14, %v1457_v13 }
 0x123   : > { %v1486_v25 = vadd.f32 %v496_v20, %v1451_v9  ;;  %v1489_v28 = vadd.f32 %v500_v15, %v1453_v10  ;;  %v1492_v29 = vadd.f32 %v498_v17, %v1449_v8  ;;  %v1501_v9 = vadd.f32 %v502_v21, %v1461_v18  ;;  %v602_v17 = vpop.permute.xlu1 %601  ;;  %v598_v21 = vpop.permute.xlu0 %597 }
 0x124   : > { %v565_v6 = vmul.f32 %v551_v0, %v1477_v19  ;;  %v567_v7 = vmul.f32 %v555_v26, %v1483_v24  ;;  %v569_v31 = vmul.f32 %v559_v22, %v1480_v23  ;;  %v511_v27 = vmul.f32 %v1050_v2, %v1050_v2 }
 0x125   : > { %v566_v5 = vmul.f32 %v551_v0, %v1486_v25  ;;  %v568_v10 = vmul.f32 %v555_v26, %v1492_v29  ;;  %v512_v8 = vmul.f32 %v1052_v4, %v1052_v4  ;;  %v570_v33 = vmul.f32 %v559_v22, %v1489_v28 }
 0x126   : > { %v573_v32 = vadd.f32 %v567_v7, %v565_v6  ;;  %v515_v13 = vstv %s1474_s25  ;;  %v571_v36 = vmul.f32 %v563_v34, %v1496_v30  ;;  %v513_v38 = vsub.f32 1.0, %v511_v27  ;;  %s795_s25 = scalar_lea.sflag [#allocation7], %s1397_s16 }
 0x127   : > { %v582_v35 = vadd.f32 %v568_v10, %v566_v5  ;;  %v514_v39 = vsub.f32 1.0, %v512_v8  ;;  %v572_v18 = vmul.f32 %v563_v34, %v1501_v9  ;;  %v415_v62 = vunpack.c.l.s4 %v1239_v60  ;;  %v610_v5 = vpop.permute.xlu1 %609 }
 0x128   : > { %v574_v37 = vadd.f32 %v573_v32, %v569_v31  ;;  %v516_v42 = vmul.f32 %v515_v13, %v513_v38  ;;  %v417_v0 = vlaneseq  ;;  %v591_v2 = vstv %s954_s26  ;;  %v606_v32 = vpop.permute.xlu0 %605  ;;  %s1127_s26 = scalar_lea.vmem %s1565_s8, 1024 }
 0x129   : > { %v583_v40 = vadd.f32 %v582_v35, %v570_v33  ;;  %v517_v43 = vmul.f32 %v515_v13, %v514_v39  ;;  %v416_v16 = vunpack.c.0.s8 %v415_v62  ;;  %p1128_p7 = scmp.ne.s32.totalorder %s1565_s8, %s1127_s26  ;;  %p1135_p11 = scmp.lt.s32.totalorder %s1133_s29, %s1127_s26 }
 0x12a   : > { %v575_v41 = vadd.f32 %v574_v37, %v571_v36  ;;  %v518_v46 = vadd.f32 1.0, %v516_v42  ;;  %v418_v14 = vshrl.u32 %v417_v0, 7 }
 0x12b   : > { %v584_v44 = vadd.f32 %v583_v40, %v572_v18  ;;  %v519_v47 = vadd.f32 1.0, %v517_v43  ;;  %v672_v33 = vpop.permute.xlu1 %671  ;;  %v296_v40 = vld [vmem:[%s284_s0] sm:$0x3]  ;;  %p1129_p9 = pnand %p1128_p7, %p1683_p8  ;;  %p1136_p13 = por %p1135_p11, %p1134_p6 }
 0x12c   : > { %v576_v45 = vrot.slane %v575_v41, 4  ;;  %v520_v50 = vand.u32 2147483647, %v518_v46  ;;  %v1511_v22 = vsub.s32 %v416_v16, %v418_v14  ;;  %v668_v18 = vpop.permute.xlu0 %667 }
 0x12d   : > { %v585_v48 = vrot.slane %v584_v44, 4  ;;  %v521_v51 = vand.u32 2147483647, %v519_v47  ;;  %p1130_p0 = pneg %p1129_p9 }
 0x12e   : > { %v577_v49 = vadd.f32 %v576_v45, %v575_v41  ;;  %v522_v54 = vadd.f32 1e-08, %v520_v50  ;;  %v420_v10 = vrot.slane %v413_v1, %v1511_v22 }
 0x12f   : > { %v586_v52 = vadd.f32 %v585_v48, %v584_v44  ;;  %v523_v55 = vadd.f32 1e-08, %v521_v51  ;;  %p1137_p1 = pnand %p1136_p13, %p1130_p0 }
 0x130   : > { %v578_v53 = vrot.slane %v577_v49, 2  ;;  %1053 = vlog2.f32 %v522_v54  ;;  %v427_v34 = vrot.slane %v420_v10, %v1511_v22 }
 0x131   : > { %v587_v56 = vrot.slane %v586_v52, 2  ;;  %1055 = vlog2.f32 %v523_v55  ;;  %v680_v55 = vpop.permute.xlu0 %679 }
 0x132   : > { %v579_v57 = vadd.f32 %v578_v53, %v577_v49 }
 0x133   : > { %v588_v58 = vadd.f32 %v587_v56, %v586_v52 }
 0x134   : > { %v580_v59 = vrot.slane %v579_v57, 1 }
 0x135   : > { %v589_v3 = vrot.slane %v588_v58, 1 }
 0x136   : > { %v581_v4 = vadd.f32 %v580_v59, %v579_v57 }
 0x137   : > { %v590_v11 = vadd.f32 %v589_v3, %v588_v58 }
 0x138   : > { %v592_v12 = vadd.f32 %v591_v2, %v581_v4 }
 0x139   : > { %v593_v20 = vadd.f32 %v591_v2, %v590_v11 }
 0x13a   : > { %1057 = vtanh.f32 %v592_v12  ;;  %v1054_v15 = vpop.eup %1053 }
 0x13b   : > { %1059 = vtanh.f32 %v593_v20  ;;  %v1056_v26 = vpop.eup %1055  ;;  %v525_v6 = vmul.f32 0.6931472, %v1054_v15 }
 0x13c   : > { %v527_v7 = vmul.f32 0.6931472, %v1056_v26  ;;  %v708_v26 = vstv %s956_s14 }
 0x13e   : > { %v530_v31 = vcombine.low %v525_v6, %v527_v7  ;;  %v632_v7 = vstv %s955_s19 }
 0x140   : > { %v537_v27 = vrot.slane %v530_v31, %v1511_v22 }
 0x142   : > { %v544_v44 = vrot.slane %v537_v27, %v1511_v22 }
 0x144   : > { %v1058_v8 = vpop.eup %1057 }
 0x145   : > { %v1060_v35 = vpop.eup %1059  ;;  %v618_v13 = vmul.f32 %v1058_v8, %v610_v5  ;;  %v612_v36 = vmul.f32 %v1058_v8, %v598_v21  ;;  %v616_v37 = vmul.f32 %v1058_v8, %v606_v32  ;;  %v614_v38 = vmul.f32 %v1058_v8, %v602_v17 }
 0x146   : > { %v619_v39 = vmul.f32 %v1060_v35, %v610_v5  ;;  %v613_v61 = vmul.f32 %v1060_v35, %v598_v21  ;;  %v617_v63 = vmul.f32 %v1060_v35, %v606_v32  ;;  %v615_v1 = vmul.f32 %v1060_v35, %v602_v17 }
 0x147   : > { %v1523_v41 = vadd.f32 %v614_v38, %v1483_v24  ;;  %v1526_v42 = vadd.f32 %v612_v36, %v1477_v19  ;;  %v1529_v43 = vadd.f32 %v616_v37, %v1480_v23  ;;  %v1544_v19 = vadd.f32 %v618_v13, %v1496_v30  ;;  %v719_v13 = vpop.permute.xlu0 %718 }
 0x148   : > { %v1533_v45 = vadd.f32 %v615_v1, %v1492_v29  ;;  %v1536_v46 = vadd.f32 %v613_v61, %v1486_v25  ;;  %v1539_v47 = vadd.f32 %v617_v63, %v1489_v28  ;;  %v429_v23 = vsub.f32 %v296_v40, %v427_v34  ;;  %v676_v29 = vpop.permute.xlu1 %675 }
 0x149   : > { %v684_v24 = vmul.f32 %v672_v33, %v1523_v41  ;;  %v682_v48 = vmul.f32 %v668_v18, %v1526_v42  ;;  %v1549_v51 = vadd.f32 %v619_v39, %v1501_v9  ;;  %v686_v28 = vmul.f32 %v676_v29, %v1529_v43 }
 0x14a   : > { %v685_v49 = vmul.f32 %v672_v33, %v1533_v45  ;;  %v683_v50 = vmul.f32 %v668_v18, %v1536_v46  ;;  %v1552_v52 = vsub.f32 %v429_v23, %v544_v44  ;;  %v687_v54 = vmul.f32 %v676_v29, %v1539_v47 }
 0x14b   : > { %v690_v25 = vadd.f32 %v684_v24, %v682_v48  ;;  %v688_v56 = vmul.f32 %v680_v55, %v1544_v19  ;;  %v689_v58 = vmul.f32 %v680_v55, %v1549_v51  ;;  %v628_v11 = vmul.f32 %v1058_v8, %v1058_v8  ;;  %v727_v61 = vpop.permute.xlu0 %726 }
 0x14c   : > { %v699_v53 = vadd.f32 %v685_v49, %v683_v50  ;;  %v629_v12 = vmul.f32 %v1060_v35, %v1060_v35  ;;  %v715_v35 = vpop.permute.xlu1 %714 }
 0x14d   : > { %v691_v30 = vadd.f32 %v690_v25, %v686_v28  ;;  %v630_v15 = vsub.f32 1.0, %v628_v11 }
 0x14e   : > { %v700_v57 = vadd.f32 %v699_v53, %v687_v54  ;;  %v631_v21 = vsub.f32 1.0, %v629_v12 }
 0x14f   : > { %v692_v59 = vadd.f32 %v691_v30, %v688_v56  ;;  %v633_v32 = vmul.f32 %v632_v7, %v630_v15 }
 0x150   : > { %v701_v60 = vadd.f32 %v700_v57, %v689_v58  ;;  %v634_v27 = vmul.f32 %v632_v7, %v631_v21  ;;  %v723_v39 = vpop.permute.xlu1 %722 }
 0x151   : > { %v693_v62 = vrot.slane %v692_v59, 4  ;;  %v635_v8 = vadd.f32 1.0, %v633_v32 }
 0x152   : > { %v702_v9 = vrot.slane %v701_v60, 4  ;;  %v636_v34 = vadd.f32 1.0, %v634_v27 }
 0x153   : > { %v694_v2 = vadd.f32 %v693_v62, %v692_v59  ;;  %v637_v36 = vand.u32 2147483647, %v635_v8 }
 0x154   : > { %v703_v3 = vadd.f32 %v702_v9, %v701_v60  ;;  %v638_v37 = vand.u32 2147483647, %v636_v34 }
 0x155   : > { %v695_v4 = vrot.slane %v694_v2, 2  ;;  %v639_v63 = vadd.f32 1e-08, %v637_v36 }
 0x156   : > { %v704_v16 = vrot.slane %v703_v3, 2  ;;  %v640_v1 = vadd.f32 1e-08, %v638_v37 }
 0x157   : > { %v696_v14 = vadd.f32 %v695_v4, %v694_v2 }
 0x158   : > { %v705_v20 = vadd.f32 %v704_v16, %v703_v3 }
 0x159   : > { %v697_v17 = vrot.slane %v696_v14, 1 }
 0x15a   : > { %v706_v6 = vrot.slane %v705_v20, 1 }
 0x15b   : > { %v698_v5 = vadd.f32 %v697_v17, %v696_v14 }
 0x15c   : > { %v707_v10 = vadd.f32 %v706_v6, %v705_v20 }
 0x15d   : > { %v709_v31 = vadd.f32 %v708_v26, %v698_v5 }
 0x15e   : > { %v710_v33 = vadd.f32 %v708_v26, %v707_v10 }
 0x15f   : > { %1061 = vtanh.f32 %v709_v31 }
 0x160   : > { %1063 = vtanh.f32 %v710_v33 }
 0x161   : > { %1065 = vlog2.f32 %v639_v63 }
 0x162   : > { %1067 = vlog2.f32 %v640_v1 }
 0x169   : > { %v1062_v38 = vpop.eup %1061 }
 0x16a   : > { %v1064_v18 = vpop.eup %1063  ;;  %v729_v40 = vmul.f32 %v1062_v38, %v715_v35  ;;  %v731_v44 = vmul.f32 %v1062_v38, %v719_v13  ;;  %v733_v24 = vmul.f32 %v1062_v38, %v723_v39  ;;  %v735_v48 = vmul.f32 %v1062_v38, %v727_v61 }
 0x16b   : > { %v730_v23 = vmul.f32 %v1064_v18, %v715_v35  ;;  %v732_v49 = vmul.f32 %v1064_v18, %v719_v13  ;;  %v734_v50 = vmul.f32 %v1064_v18, %v723_v39  ;;  %v736_v29 = vmul.f32 %v1064_v18, %v727_v61 }
 0x16c   : > { %v737_v25 = vadd.f32 %v729_v40, %v1526_v42  ;;  %v739_v28 = vadd.f32 %v731_v44, %v1523_v41  ;;  %v741_v53 = vadd.f32 %v733_v24, %v1529_v43  ;;  %v743_v54 = vadd.f32 %v735_v48, %v1544_v19 }
 0x16d   : > { %v738_v55 = vadd.f32 %v730_v23, %v1536_v46  ;;  %v740_v42 = vadd.f32 %v732_v49, %v1533_v45  ;;  %v742_v41 = vadd.f32 %v734_v50, %v1539_v47  ;;  %v744_v43 = vadd.f32 %v736_v29, %v1549_v51 }
 0x16e   : > { %781 = vst [vmem:[%s1561_s30] sm:$0xff] %v737_v25  ;;  %783 = vst [vmem:[%s1561_s30 + $0x10] sm:$0xff] %v739_v28  ;;  %v745_v19 = vmul.f32 %v1062_v38, %v1062_v38  ;;  %v746_v30 = vmul.f32 %v1064_v18, %v1064_v18  ;;  %v749_v45 = vstv %s1557_s28 }
 0x16f   : > { %785 = vst [vmem:[%s1561_s30 + $0x20] sm:$0xff] %v741_v53  ;;  %787 = vst [vmem:[%s1561_s30 + $0x30] sm:$0xff] %v743_v54 }
 0x170   : > { %782 = vst [vmem:[%s1561_s30 + $0x8] sm:$0xff] %v738_v55  ;;  %784 = vst [vmem:[%s1561_s30 + $0x18] sm:$0xff] %v740_v42 }
 0x171   : > { %786 = vst [vmem:[%s1561_s30 + $0x28] sm:$0xff] %v742_v41  ;;  %788 = vst [vmem:[%s1561_s30 + $0x38] sm:$0xff] %v744_v43 }
 0x172   : > { %1140 = shalt.err (!%p1137_p1)
}
 0x173   : > { %s1141_s0 = scalar_lea.hbm %s1574_s23, 1024  ;;  %s1145_s28 = scalar_lea.hbm %s1673_s6, 2048 }
 0x174   : > { %p1142_p3 = scmp.ne.s32.totalorder %s1574_s23, %s1141_s0  ;;  %p1146_p10 = scmp.lt.u32.totalorder %s1574_s23, %s1673_s6 }
 0x175   : > { %p1147_p12 = scmp.lt.u32.totalorder %s1145_s28, %s1141_s0  ;;  %p1149_p7 = scmp.lt.u32.totalorder %s1141_s0, %s1574_s23 }
 0x176   : > { %p1143_p4 = pnand %p1142_p3, %p1683_p8 }
 0x177   : > { %p1148_p2 = por %p1147_p12, %p1146_p10 }
 0x178   : > { %p1144_p5 = pneg %p1143_p4 }
 0x179   : > { %p1150_p9 = por %p1149_p7, %p1148_p2 }
 0x17b   : > { %p1151_p0 = pnand %p1150_p9, %p1144_p5 }
 0x17d   : > { %1154 = shalt.err (!%p1151_p0)
}
 0x17e   : > { %s1241_s17 = smov 256   ;;  %s1242_s24 = smov 512   ;;  %v747_v46 = vsub.f32 1.0, %v745_v19  ;;  %v748_v47 = vsub.f32 1.0, %v746_v30  ;;  %v1066_v62 = vpop.eup %1065  ;;  %vm791_vm0 = vcmp.lt.s32.totalorder %v417_v0, 256 }
 0x17f   : > { %s1243_s26 = smov 16   ;;  %v1068_v3 = vpop.eup %1067  ;;  %v642_v4 = vmul.f32 0.6931472, %v1066_v62  ;;  %s1244_s19 = smov [#allocation9]  }
 0x180   : > { %971 = dma.vmem_to_hbm [thread:$0]  (%p1683_p8), %s1565_s8, 1024, %s1574_s23, %s795_s25, %s1241_s17, %s1242_s24, %s1243_s26   ;;  %v750_v51 = vmul.f32 %v749_v45, %v747_v46  ;;  %v751_v56 = vmul.f32 %v749_v45, %v748_v47  ;;  %v644_v11 = vmul.f32 0.6931472, %v1068_v3 }
 0x181   : > { %s950_s8 = sshll.u32 %s1397_s16, 1  ;;  %s968_s23 = sshll.u32 %s1312_s13, 5 }
 0x182   : > { %v752_v57 = vadd.f32 1.0, %v750_v51  ;;  %v753_v58 = vadd.f32 1.0, %v751_v56  ;;  %v647_v12 = vcombine.low %v642_v4, %v644_v11  ;;  %s279_s25 = scalar_lea.vmem [#allocation9], %s950_s8  ;;  %s1624_s0 = scalar_lea.hbm %s1674_s7, %s968_s23 }
 0x183   : > { %s830_s20 = sshll.u32 %s279_s25, 4  ;;  %s800_s13 = scalar_lea.sflag [#allocation10], %s1397_s16  ;;  %s1626_s20 = int_to_ptr.vmem [resolvable:$true] %s830_s20 }
 0x184   : > { %v754_v59 = vand.u32 2147483647, %v752_v57  ;;  %v755_v60 = vand.u32 2147483647, %v753_v58  ;;  %v654_v14 = vrot.slane %v647_v12, %v1511_v22  ;;  %s1155_s14 = scalar_lea.vmem %s1626_s20, 32  ;;  %s1159_s28 = sshll.u32 %s1244_s19, 4  ;;  %s1160_s28 = int_to_ptr.vmem [resolvable:$false] %s1159_s28 }
 0x185   : > { %p1156_p6 = scmp.ne.s32.totalorder %s1626_s20, %s1155_s14  ;;  %s1161_s30 = scalar_lea.vmem %s1160_s28, 64 }
 0x186   : > { %v756_v9 = vadd.f32 1e-08, %v754_v59  ;;  %v757_v2 = vadd.f32 1e-08, %v755_v60  ;;  %v661_v21 = vrot.slane %v654_v14, %v1511_v22  ;;  %p1162_p1 = scmp.lt.s32.totalorder %s1626_s20, %s1160_s28  ;;  %p1163_p3 = scmp.lt.s32.totalorder %s1161_s30, %s1155_s14 }
 0x187   : > { %p1157_p11 = pnand %p1156_p6, %p1683_p8 }
 0x188   : > { %1069 = vlog2.f32 %v756_v9  ;;  %v663_v7 = vsub.f32 %v1552_v52, %v661_v21  ;;  %p1164_p4 = por %p1163_p3, %p1162_p1 }
 0x189   : > { %1071 = vlog2.f32 %v757_v2  ;;  %p1158_p13 = pneg %p1157_p11 }
 0x18b   : > { %p1165_p5 = pnand %p1164_p4, %p1158_p13 }
 0x192   : > { %v1070_v16 = vpop.eup %1069 }
 0x193   : > { %v1072_v20 = vpop.eup %1071  ;;  %v759_v17 = vmul.f32 0.6931472, %v1070_v16 }
 0x194   : > { %v761_v15 = vmul.f32 0.6931472, %v1072_v20 }
 0x196   : > { %v764_v26 = vcombine.low %v759_v17, %v761_v15 }
 0x198   : > { %v771_v6 = vrot.slane %v764_v26, %v1511_v22 }
 0x19a   : > { %v778_v5 = vrot.slane %v771_v6, %v1511_v22 }
 0x19c   : > { %v780_v10 = vsub.f32 %v663_v7, %v778_v5 }
 0x19e   : > { %793 = vst.msk [vmem:[%s279_s25] sm:$0x3] %vm791_vm0, %v780_v10 }
 0x19f   : > { %1168 = shalt.err (!%p1165_p5)
}
 0x1a0   : > { %s1169_s16 = scalar_lea.hbm %s1624_s0, 32  ;;  %s1173_s24 = scalar_lea.hbm %s1674_s7, 64 }
 0x1a1   : > { %p1170_p10 = scmp.ne.s32.totalorder %s1624_s0, %s1169_s16  ;;  %p1174_p7 = scmp.lt.u32.totalorder %s1624_s0, %s1674_s7 }
 0x1a2   : > { %p1175_p9 = scmp.lt.u32.totalorder %s1173_s24, %s1169_s16  ;;  %p1177_p6 = scmp.lt.u32.totalorder %s1169_s16, %s1624_s0 }
 0x1a3   : > { %p1171_p12 = pnand %p1170_p10, %p1683_p8 }
 0x1a4   : > { %p1176_p0 = por %p1175_p9, %p1174_p7 }
 0x1a5   : > { %p1172_p2 = pneg %p1171_p12 }
 0x1a6   : > { %p1178_p11 = por %p1177_p6, %p1176_p0 }
 0x1a8   : > { %p1179_p13 = pnand %p1178_p11, %p1172_p2 }
 0x1aa   : > { %1182 = shalt.err (!%p1179_p13)
}
 0x1ab   : > { %972 = dma.vmem_to_hbm [thread:$0]  (%p1683_p8), %s1626_s20, 32, %s1624_s0, %s800_s13  }
 0x1ac PF: > { %s842_s23 = sand.u32 1, %s1215_s1   ;;  %p1684_p1 = scmp.ne.s32.totalorder %s1680_s22, 0 }
 0x1ad   : > { %p1685_p3 = scmp.ge.s32.totalorder %s1227_s12, 2  ;;  %s843_s25 = scalar_lea.sflag [#allocation7], %s842_s23 }
 0x1af   : > { %p980_p4 = pnand %p1685_p3, %p1684_p1 }
 0x1b1   : > { %1206 = dma.done.wait (!%p980_p4), %s843_s25, 1024  }
 0x1b2   : > { %1208 = vsyncadd (!%p980_p4), %s843_s25, 4294966272  ;;  %s852_s27 = scalar_lea.sflag [#allocation10], %s842_s23 }
 0x1b3   : > { %1210 = dma.done.wait (!%p980_p4), %s852_s27, 32  }
 0x1b4   : > { %1212 = vsyncadd (!%p980_p4), %s852_s27, 4294967264  ;;  %p34_p8 = scmp.ge.s32.totalorder %s1316_s15, 4   ;;  %s1686_s1 = smov %s1219_s10 }
 0x1b5   : > { %s1687_s10 = smov %s1223_s11  ;;  %s1688_s11 = smov %s1328_s18 }
 0x1b6   : > { %s1689_s12 = smov %s1316_s15  ;;  %36 = sbr.rel (!%p34_p8) target bundleno = 32 (0x20), region = 101 }
 0x1bd   :  { %857 = vsyncpa [#allocation6], 1 }
 0x1be   :  { %859 = vsyncpa [#allocation6 + $0x1], 1 }
 0x1bf   :  { %860 = vsyncpa [#allocation7], 1 }
 0x1c0   :  { %862 = vsyncpa [#allocation7 + $0x1], 1 }
 0x1c1   :  { %863 = vsyncpa [#allocation10], 1 }
 0x1c2   :  { %865 = vsyncpa [#allocation10 + $0x1], 1 }

</bundles_post_ra>
